<compile_context>
chip_gen: v7x
topology: tpu7x:2x2x1
jax: 0.10.0
libtpu: 0.0.40
codegen_flags: <defaults>
</compile_context>

<pallas_src>
import jax
import jax.numpy as jnp
from jax.experimental import pallas as pl
from jax.experimental.pallas import tpu as pltpu

_LANE = 128       # vreg lane width (last dim)
_SUBLANE = 8      # vreg sublane width (second-to-last dim)
_NEG_SLOPE = 0.01  # torch.nn.functional.leaky_relu default negative_slope


def _round_up(n, m):
    return ((n + m - 1) // m) * m


def _leaky_relu(v):
    return jnp.where(v > 0, v, _NEG_SLOPE * v)


def mlp4_kernel(x_ref, w1_ref, b1_ref, w2_ref, b2_ref,
                w3_ref, b3_ref, w4_ref, b4_ref, o_ref):
    """One batch tile: 4x (MXU matmul, f32 accumulate) + bias + leaky_relu on the VPU."""
    cdt = w1_ref.dtype  # compute dtype for MXU operands (f32 or bf16)
    # x arrives in f32 and is cast in-kernel (cheaper than an extra wrapper pass).
    h = jnp.dot(x_ref[...].astype(cdt), w1_ref[...],
                preferred_element_type=jnp.float32)
    h = _leaky_relu(h + b1_ref[...])
    h = jnp.dot(h.astype(cdt), w2_ref[...], preferred_element_type=jnp.float32)
    h = _leaky_relu(h + b2_ref[...])
    h = jnp.dot(h.astype(cdt), w3_ref[...], preferred_element_type=jnp.float32)
    h = _leaky_relu(h + b3_ref[...])
    h = jnp.dot(h.astype(cdt), w4_ref[...], preferred_element_type=jnp.float32)
    h = _leaky_relu(h + b4_ref[...])
    o_ref[...] = h.astype(o_ref.dtype)


def prepare_params(params, *, compute_dtype=jnp.float32):
    """Pad/cast NeuralNetwork2 parameters ONCE (hoisted out of the per-call path).

    params: dict with w{i}: (in_i, out_i)  [already transposed vs torch's (out,in)]
            and b{i}: (out_i,) or (1, out_i), i = 1..4.
    Returns dict of arrays:
      w1: (input_dim, p1)  -- layer-1 K kept at the REAL input_dim (x stays unpadded)
      w{2,3,4}: (p_{i-1}, p_i)   b{i}: (1, p_i) float32
    with p_i = round_up(out_i, 128) and zero padding, so padded lanes are exactly
    zero after bias+leaky_relu and contribute nothing to later contractions.
    compute_dtype: jnp.float32 (exact) or jnp.bfloat16 (throughput; recommended on
    v5e, v6e and v7x -- the MXU is bf16-native, accumulation stays f32).
    """
    out = {}
    prev_p = params["w1"].shape[0]          # layer-1 K = real input_dim (no pad)
    for i in range(1, 5):
        wi = jnp.asarray(params[f"w{i}"])
        bi = jnp.asarray(params[f"b{i}"]).reshape(1, -1)
        fi, fo = wi.shape
        po = _round_up(fo, _LANE)
        out[f"w{i}"] = jnp.zeros((prev_p, po), compute_dtype).at[:fi, :fo].set(
            wi.astype(compute_dtype))
        out[f"b{i}"] = jnp.zeros((1, po), jnp.float32).at[:, :fo].set(
            bi.astype(jnp.float32))
        prev_p = po
    return out


def neural_network2_forward(x, padded_params, *, out_dim, block_b=None,
                            num_batch_tiles=1):
    """Forward pass of NeuralNetwork2 (4x Linear + leaky_relu).

    x: (B, input_dim) float32, unpadded.
    padded_params: output of prepare_params() (pad once, reuse every call).
    out_dim: real output width (static under jit) -- used to slice off lane padding.
    block_b: optional explicit batch tile; default picks one tile over the whole
             batch (best on single-TC v5e/v6e).
    num_batch_tiles: set 2 on v7x to balance the two TensorCores.
    """
    B, d_in = x.shape
    w = [padded_params[f"w{i}"] for i in range(1, 5)]
    b = [padded_params[f"b{i}"] for i in range(1, 5)]
    assert w[0].shape[0] == d_in, "x feature dim must match w1's (unpadded) K dim"
    p_out = w[3].shape[1]

    # Batch tile selection: one tile for single-TC chips, balanced tiles for v7x.
    tb = pl.cdiv(B, num_batch_tiles) if block_b is None else block_b
    tb = _round_up(min(tb, 512), _SUBLANE)     # cap keeps per-tile VMEM small
    grid = (pl.cdiv(B, tb),)                   # trailing partial block is masked

    def _resident_spec(arr):
        nd = arr.ndim
        # Full-array block + constant block index -> DMA'd once, stays VMEM-resident.
        # TODO(synk): pipeline_mode=pl.Buffered(1) would drop the dead second buffer
        # (~0.3 MiB); omitted for compile-safety on older runtimes.
        return pl.BlockSpec(arr.shape, lambda i, _nd=nd: (0,) * _nd)

    ops = [x]
    in_specs = [pl.BlockSpec((tb, d_in), lambda i: (i, 0))]
    for wi, bi in zip(w, b):
        ops += [wi, bi]
        in_specs += [_resident_spec(wi), _resident_spec(bi)]

    out_padded = pl.pallas_call(
        mlp4_kernel,
        out_shape=jax.ShapeDtypeStruct((B, p_out), jnp.float32),
        grid=grid,
        in_specs=in_specs,
        out_specs=pl.BlockSpec((tb, p_out), lambda i: (i, 0)),
        compiler_params=pltpu.CompilerParams(
            # Batch tiles are independent -> megacore-shardable on v7x.
            dimension_semantics=("parallel",),
        ),
    )(*ops)

    return out_padded[:, :out_dim]


# ---------------- parameter init (matches the PyTorch module) ----------------
def _kaiming_uniform(key, fan_in, fan_out):
    # Matches the module's explicit nn.init.kaiming_uniform_(w, nonlinearity='leaky_relu')
    # (default a=0 -> gain=sqrt(2), bound = gain*sqrt(3/fan_in)); returned as (in, out).
    gain = jnp.sqrt(2.0)
    bound = gain * jnp.sqrt(3.0 / fan_in)
    return jax.random.uniform(key, (fan_in, fan_out), jnp.float32,
                              minval=-bound, maxval=bound)


def _linear_bias(key, fan_in, fan_out):
    # torch nn.Linear default bias init: U(-1/sqrt(fan_in), 1/sqrt(fan_in)).
    bound = 1.0 / jnp.sqrt(float(fan_in))
    return jax.random.uniform(key, (1, fan_out), jnp.float32,
                              minval=-bound, maxval=bound)


def make_params(key, input_dim, h1, h2, h3, output_dim):
    ks = jax.random.split(key, 8)
    shapes = [(input_dim, h1), (h1, h2), (h2, h3), (h3, output_dim)]
    params = {}
    for i, (fi, fo) in enumerate(shapes, start=1):
        params[f"w{i}"] = _kaiming_uniform(ks[2 * (i - 1)], fi, fo)
        params[f"b{i}"] = _linear_bias(ks[2 * (i - 1) + 1], fi, fo)
    return params


if __name__ == "__main__":
    key = jax.random.PRNGKey(0)
    kx, kp = jax.random.split(key)

    # Small shapes consistent with the module; batch chosen so it is NOT a multiple
    # of 8 or of the balanced tile, exercising the masked partial-final-block path.
    batch, input_dim, h1, h2, h3, output_dim = 300, 16, 32, 64, 32, 8

    x = jax.random.normal(kx, (batch, input_dim), dtype=jnp.float32)
    params = make_params(kp, input_dim, h1, h2, h3, output_dim)

    # Pure-JAX reference (same semantics as the PyTorch forward).
    def ref(xv, p):
        h = xv
        for i in range(1, 5):
            h = jnp.dot(h, p[f"w{i}"]) + p[f"b{i}"]
            h = jnp.where(h > 0, h, _NEG_SLOPE * h)
        return h

    expected = ref(x, params)

    fwd = jax.jit(neural_network2_forward,
                  static_argnames=("out_dim", "block_b", "num_batch_tiles"))

    # f32 path, single batch tile (v5e/v6e default): exact up to MXU f32 rounding.
    pp_f32 = prepare_params(params, compute_dtype=jnp.float32)
    out_f32 = jax.block_until_ready(fwd(x, pp_f32, out_dim=output_dim))
    assert out_f32.shape == (batch, output_dim)
    assert jnp.allclose(out_f32, expected, atol=1e-4, rtol=1e-4)

    # Two balanced batch tiles (v7x megacore config): grid=(2,), tb=152, and the
    # second block is partial (304 > 300) -> exercises masked output stores.
    out_2t = jax.block_until_ready(
        fwd(x, pp_f32, out_dim=output_dim, num_batch_tiles=2))
    assert out_2t.shape == (batch, output_dim)
    assert jnp.allclose(out_2t, expected, atol=1e-4, rtol=1e-4)

    # bf16 compute path (recommended for throughput on v5e/v6e/v7x): ~1e-2-level
    # deviation from the f32 reference is expected from the operand cast.
    pp_bf16 = prepare_params(params, compute_dtype=jnp.bfloat16)
    out_bf16 = jax.block_until_ready(fwd(x, pp_bf16, out_dim=output_dim))
    assert out_bf16.shape == (batch, output_dim)
    assert jnp.allclose(out_bf16, expected, atol=1e-1, rtol=5e-2)

    print("KERNEL_OK")
</pallas_src>

<mosaic_0001>
module attributes {stable_mosaic.version = 11 : i64} {
  func.func @mlp4_kernel(%arg0: i32, %arg1: memref<304x16xf32, #tpu.memory_space<vmem>>, %arg2: memref<16x128xf32, #tpu.memory_space<vmem>>, %arg3: memref<1x128xf32, #tpu.memory_space<vmem>>, %arg4: memref<128x128xf32, #tpu.memory_space<vmem>>, %arg5: memref<1x128xf32, #tpu.memory_space<vmem>>, %arg6: memref<128x128xf32, #tpu.memory_space<vmem>>, %arg7: memref<1x128xf32, #tpu.memory_space<vmem>>, %arg8: memref<128x128xf32, #tpu.memory_space<vmem>>, %arg9: memref<1x128xf32, #tpu.memory_space<vmem>>, %arg10: memref<304x128xf32, #tpu.memory_space<vmem>>) attributes {dimension_semantics = [#tpu.dimension_semantics<parallel>], iteration_bounds = array<i64: 1>, scalar_prefetch = 0 : i64, scratch_operands = 0 : i64, tpu.core_type = #tpu.core_type<tc>, window_params = [{transform_indices = @transform_0, window_bounds = array<i64: 304, 16>}, {pipeline_mode = #tpu.pipeline_mode<synchronous>, transform_indices = @transform_1, window_bounds = array<i64: 16, 128>}, {pipeline_mode = #tpu.pipeline_mode<synchronous>, transform_indices = @transform_2, window_bounds = array<i64: 1, 128>}, {pipeline_mode = #tpu.pipeline_mode<synchronous>, transform_indices = @transform_3, window_bounds = array<i64: 128, 128>}, {pipeline_mode = #tpu.pipeline_mode<synchronous>, transform_indices = @transform_4, window_bounds = array<i64: 1, 128>}, {pipeline_mode = #tpu.pipeline_mode<synchronous>, transform_indices = @transform_5, window_bounds = array<i64: 128, 128>}, {pipeline_mode = #tpu.pipeline_mode<synchronous>, transform_indices = @transform_6, window_bounds = array<i64: 1, 128>}, {pipeline_mode = #tpu.pipeline_mode<synchronous>, transform_indices = @transform_7, window_bounds = array<i64: 128, 128>}, {pipeline_mode = #tpu.pipeline_mode<synchronous>, transform_indices = @transform_8, window_bounds = array<i64: 1, 128>}, {transform_indices = @transform_9, window_bounds = array<i64: 304, 128>}]} {
    %c0 = arith.constant 0 : index
    %c0_0 = arith.constant 0 : index
    %0 = vector.load %arg1[%c0, %c0_0] : memref<304x16xf32, #tpu.memory_space<vmem>>, vector<304x16xf32>
    %c0_1 = arith.constant 0 : index
    %c0_2 = arith.constant 0 : index
    %1 = vector.load %arg2[%c0_1, %c0_2] : memref<16x128xf32, #tpu.memory_space<vmem>>, vector<16x128xf32>
    %cst = arith.constant dense<0.000000e+00> : vector<304x128xf32>
    %2 = tpu.matmul %0, %1, %cst {dimension_numbers = #tpu.dot_dimension_numbers<[1], [0], [0], [1], [0, 0, 1, 1], [], []>} : vector<304x16xf32>, vector<16x128xf32>, vector<304x128xf32> -> vector<304x128xf32>
    %c0_3 = arith.constant 0 : index
    %c0_4 = arith.constant 0 : index
    %3 = vector.load %arg3[%c0_3, %c0_4] : memref<1x128xf32, #tpu.memory_space<vmem>>, vector<1x128xf32>
    %4 = vector.broadcast %3 : vector<1x128xf32> to vector<304x128xf32>
    %5 = arith.addf %2, %4 : vector<304x128xf32>
    %cst_5 = arith.constant 0.000000e+00 : f32
    %6 = vector.broadcast %cst_5 : f32 to vector<304x128xf32>
    %7 = arith.cmpf ogt, %5, %6 : vector<304x128xf32>
    %cst_6 = arith.constant 0.00999999977 : f32
    %8 = vector.broadcast %cst_6 : f32 to vector<304x128xf32>
    %9 = arith.mulf %8, %5 : vector<304x128xf32>
    %10 = arith.select %7, %5, %9 : vector<304x128xi1>, vector<304x128xf32>
    %c0_7 = arith.constant 0 : index
    %c0_8 = arith.constant 0 : index
    %11 = vector.load %arg4[%c0_7, %c0_8] : memref<128x128xf32, #tpu.memory_space<vmem>>, vector<128x128xf32>
    %cst_9 = arith.constant dense<0.000000e+00> : vector<304x128xf32>
    %12 = tpu.matmul %10, %11, %cst_9 {dimension_numbers = #tpu.dot_dimension_numbers<[1], [0], [0], [1], [0, 0, 1, 1], [], []>} : vector<304x128xf32>, vector<128x128xf32>, vector<304x128xf32> -> vector<304x128xf32>
    %c0_10 = arith.constant 0 : index
    %c0_11 = arith.constant 0 : index
    %13 = vector.load %arg5[%c0_10, %c0_11] : memref<1x128xf32, #tpu.memory_space<vmem>>, vector<1x128xf32>
    %14 = vector.broadcast %13 : vector<1x128xf32> to vector<304x128xf32>
    %15 = arith.addf %12, %14 : vector<304x128xf32>
    %cst_12 = arith.constant 0.000000e+00 : f32
    %16 = vector.broadcast %cst_12 : f32 to vector<304x128xf32>
    %17 = arith.cmpf ogt, %15, %16 : vector<304x128xf32>
    %cst_13 = arith.constant 0.00999999977 : f32
    %18 = vector.broadcast %cst_13 : f32 to vector<304x128xf32>
    %19 = arith.mulf %18, %15 : vector<304x128xf32>
    %20 = arith.select %17, %15, %19 : vector<304x128xi1>, vector<304x128xf32>
    %c0_14 = arith.constant 0 : index
    %c0_15 = arith.constant 0 : index
    %21 = vector.load %arg6[%c0_14, %c0_15] : memref<128x128xf32, #tpu.memory_space<vmem>>, vector<128x128xf32>
    %cst_16 = arith.constant dense<0.000000e+00> : vector<304x128xf32>
    %22 = tpu.matmul %20, %21, %cst_16 {dimension_numbers = #tpu.dot_dimension_numbers<[1], [0], [0], [1], [0, 0, 1, 1], [], []>} : vector<304x128xf32>, vector<128x128xf32>, vector<304x128xf32> -> vector<304x128xf32>
    %c0_17 = arith.constant 0 : index
    %c0_18 = arith.constant 0 : index
    %23 = vector.load %arg7[%c0_17, %c0_18] : memref<1x128xf32, #tpu.memory_space<vmem>>, vector<1x128xf32>
    %24 = vector.broadcast %23 : vector<1x128xf32> to vector<304x128xf32>
    %25 = arith.addf %22, %24 : vector<304x128xf32>
    %cst_19 = arith.constant 0.000000e+00 : f32
    %26 = vector.broadcast %cst_19 : f32 to vector<304x128xf32>
    %27 = arith.cmpf ogt, %25, %26 : vector<304x128xf32>
    %cst_20 = arith.constant 0.00999999977 : f32
    %28 = vector.broadcast %cst_20 : f32 to vector<304x128xf32>
    %29 = arith.mulf %28, %25 : vector<304x128xf32>
    %30 = arith.select %27, %25, %29 : vector<304x128xi1>, vector<304x128xf32>
    %c0_21 = arith.constant 0 : index
    %c0_22 = arith.constant 0 : index
    %31 = vector.load %arg8[%c0_21, %c0_22] : memref<128x128xf32, #tpu.memory_space<vmem>>, vector<128x128xf32>
    %cst_23 = arith.constant dense<0.000000e+00> : vector<304x128xf32>
    %32 = tpu.matmul %30, %31, %cst_23 {dimension_numbers = #tpu.dot_dimension_numbers<[1], [0], [0], [1], [0, 0, 1, 1], [], []>} : vector<304x128xf32>, vector<128x128xf32>, vector<304x128xf32> -> vector<304x128xf32>
    %c0_24 = arith.constant 0 : index
    %c0_25 = arith.constant 0 : index
    %33 = vector.load %arg9[%c0_24, %c0_25] : memref<1x128xf32, #tpu.memory_space<vmem>>, vector<1x128xf32>
    %34 = vector.broadcast %33 : vector<1x128xf32> to vector<304x128xf32>
    %35 = arith.addf %32, %34 : vector<304x128xf32>
    %cst_26 = arith.constant 0.000000e+00 : f32
    %36 = vector.broadcast %cst_26 : f32 to vector<304x128xf32>
    %37 = arith.cmpf ogt, %35, %36 : vector<304x128xf32>
    %cst_27 = arith.constant 0.00999999977 : f32
    %38 = vector.broadcast %cst_27 : f32 to vector<304x128xf32>
    %39 = arith.mulf %38, %35 : vector<304x128xf32>
    %40 = arith.select %37, %35, %39 : vector<304x128xi1>, vector<304x128xf32>
    %c0_28 = arith.constant 0 : index
    %c0_29 = arith.constant 0 : index
    %41 = vector.load %arg10[%c0_28, %c0_29] : memref<304x128xf32, #tpu.memory_space<vmem>>, vector<304x128xf32>
    tpu.vector_store %arg10[%c0_28, %c0_29], %40 {strides = array<i32>} : memref<304x128xf32, #tpu.memory_space<vmem>>, vector<304x128xf32>,
    return
  }
  func.func @transform_0(%arg0: i32) -> (i32, i32) {
    %c0_i32 = arith.constant 0 : i32
    %c0_i32_0 = arith.constant 0 : i32
    return %arg0, %c0_i32 : i32, i32
  }
  func.func @transform_1(%arg0: i32) -> (i32, i32) {
    %c0_i32 = arith.constant 0 : i32
    %c0_i32_0 = arith.constant 0 : i32
    %c0_i32_1 = arith.constant 0 : i32
    return %c0_i32, %c0_i32_0 : i32, i32
  }
  func.func @transform_2(%arg0: i32) -> (i32, i32) {
    %c0_i32 = arith.constant 0 : i32
    %c0_i32_0 = arith.constant 0 : i32
    %c0_i32_1 = arith.constant 0 : i32
    return %c0_i32, %c0_i32_0 : i32, i32
  }
  func.func @transform_3(%arg0: i32) -> (i32, i32) {
    %c0_i32 = arith.constant 0 : i32
    %c0_i32_0 = arith.constant 0 : i32
    %c0_i32_1 = arith.constant 0 : i32
    return %c0_i32, %c0_i32_0 : i32, i32
  }
  func.func @transform_4(%arg0: i32) -> (i32, i32) {
    %c0_i32 = arith.constant 0 : i32
    %c0_i32_0 = arith.constant 0 : i32
    %c0_i32_1 = arith.constant 0 : i32
    return %c0_i32, %c0_i32_0 : i32, i32
  }
  func.func @transform_5(%arg0: i32) -> (i32, i32) {
    %c0_i32 = arith.constant 0 : i32
    %c0_i32_0 = arith.constant 0 : i32
    %c0_i32_1 = arith.constant 0 : i32
    return %c0_i32, %c0_i32_0 : i32, i32
  }
  func.func @transform_6(%arg0: i32) -> (i32, i32) {
    %c0_i32 = arith.constant 0 : i32
    %c0_i32_0 = arith.constant 0 : i32
    %c0_i32_1 = arith.constant 0 : i32
    return %c0_i32, %c0_i32_0 : i32, i32
  }
  func.func @transform_7(%arg0: i32) -> (i32, i32) {
    %c0_i32 = arith.constant 0 : i32
    %c0_i32_0 = arith.constant 0 : i32
    %c0_i32_1 = arith.constant 0 : i32
    return %c0_i32, %c0_i32_0 : i32, i32
  }
  func.func @transform_8(%arg0: i32) -> (i32, i32) {
    %c0_i32 = arith.constant 0 : i32
    %c0_i32_0 = arith.constant 0 : i32
    %c0_i32_1 = arith.constant 0 : i32
    return %c0_i32, %c0_i32_0 : i32, i32
  }
  func.func @transform_9(%arg0: i32) -> (i32, i32) {
    %c0_i32 = arith.constant 0 : i32
    %c0_i32_0 = arith.constant 0 : i32
    return %arg0, %c0_i32 : i32, i32
  }
}

</mosaic_0001>

<bundles_post_ra>
// kernel: neural_network2_forward.1
= control target key start
LH: loop header
LB: loop body
LE: loop exit
PB: predicated region body
PF: predicated region fallthrough
CT: control target
= control target key end

     0   :  { %14 = vsyncpa [#allocation3], 0  ;;  %s2511_s30 = smov [#allocation2]   ;;  %s3140_s0 = inlined_call_operand.vmem [shape: f32[300,16], index: 0, kind: input, shape index: {}]   ;;  %s3141_s1 = inlined_call_operand.vmem [shape: f32[16,128], index: 1, kind: input, shape index: {}]   ;;  %s3142_s2 = inlined_call_operand.vmem [shape: f32[1,128], index: 2, kind: input, shape index: {}]   ;;  %s3143_s3 = inlined_call_operand.vmem [shape: f32[128,128], index: 3, kind: input, shape index: {}]   ;;  %s3144_s4 = inlined_call_operand.vmem [shape: f32[1,128], index: 4, kind: input, shape index: {}]   ;;  %s3145_s5 = inlined_call_operand.vmem [shape: f32[128,128], index: 5, kind: input, shape index: {}]   ;;  %s3146_s6 = inlined_call_operand.vmem [shape: f32[1,128], index: 6, kind: input, shape index: {}]   ;;  %s3147_s7 = inlined_call_operand.hbm [shape: f32[128,128], index: 7, kind: input, shape index: {}]   ;;  %s3148_s8 = inlined_call_operand.vmem [shape: f32[1,128], index: 8, kind: input, shape index: {}]   ;;  %s3149_s9 = inlined_call_operand.vmem [shape: f32[300,128], index: 9, kind: output, shape index: {}]  }
   0x1   :  { %s34_s10 = sshll.u32 %s2511_s30, 4  ;;  %s2487_s13 = scalar_lea.hbm %s3147_s7, 2048  ;;  %s35_s10 = int_to_ptr.vmem [resolvable:$true] %s34_s10 }
   0x2   :  { %p2488_p0 = scmp.ne.s32.totalorder %s3147_s7, %s2487_s13  ;;  %p2491_p1 = scmp.lt.u32.totalorder %s2487_s13, %s3147_s7 }
   0x4   :  { %p2493_p2 = pnand %p2491_p1, %p2488_p0 }
   0x6   :  { %2496 = shalt.err (!%p2493_p2)
}
   0x7   :  { %s2497_s18 = scalar_lea.vmem %s35_s10, 2048  ;;  %p2502_p4 = scmp.lt.s32.totalorder %s35_s10, %s35_s10 }
   0x8   :  { %p2498_p3 = scmp.ne.s32.totalorder %s35_s10, %s2497_s18  ;;  %p2503_p5 = scmp.lt.s32.totalorder %s2497_s18, %s2497_s18 }
   0xa   :  { %p2504_p6 = por %p2503_p5, %p2502_p4 }
   0xc   :  { %p2505_p7 = pnand %p2504_p6, %p2498_p3 }
   0xe   :  { %2508 = shalt.err (!%p2505_p7)
}
   0xf   :  { %s2512_s19 = smov 128   ;;  %s2513_s20 = smov 8  }
  0x10   :  { %40 = dma.hbm_to_vmem [thread:$0]  %s3147_s7, 2048, %s35_s10, [#allocation3], %s2512_s19, %s2512_s19, %s2513_s20  }
  0x11   :  { %2509 = dma.done.wait [#allocation3], 2048  }
  0x12   :  { %2510 = vsyncadd [#allocation3], 4294965248  ;;  %vm93_vm0 = vcmask 130048   ;;  %v84_v0 = vld [vmem:[%s3141_s1] sm:$0xff]  ;;  %v85_v1 = vld [vmem:[%s3141_s1 + $0x8] sm:$0xff] }
  0x13   :  { %v46_v2 = vld [vmem:[%s3140_s0] sm:$0xff]  ;;  %v2368_v3 = vpack.c.bf16 %v85_v1, %v84_v0  ;;  %v47_v4 = vld [vmem:[%s3140_s0 + $0x8] sm:$0xff]  ;;  %v48_v5 = vld [vmem:[%s3140_s0 + $0x10] sm:$0xff] }
  0x14   :  { %2044 = vmatprep.mubr.msk.f32.mxu0 %vm93_vm0, %v46_v2  ;;  %v49_v6 = vld [vmem:[%s3140_s0 + $0x18] sm:$0xff]  ;;  %v50_v7 = vld [vmem:[%s3140_s0 + $0x20] sm:$0xff]  ;;  %v51_v8 = vld [vmem:[%s3140_s0 + $0x28] sm:$0xff] }
  0x15   :  { %2369 = vmatprep.subr.bf16.mxu0 %v2368_v3  ;;  %v52_v9 = vld [vmem:[%s3140_s0 + $0x30] sm:$0xff]  ;;  %v577_v10 = vld [vmem:[%s3143_s3] sm:$0xff]  ;;  %v578_v11 = vld [vmem:[%s3143_s3 + $0x8] sm:$0xff] }
  0x16   :  { %2371 = vmatpush3.bf16.msra.mxu0 %v2368_v3  ;;  %v2372_v12 = vpack.c.bf16 %v578_v11, %v577_v10  ;;  %v579_v13 = vld [vmem:[%s3143_s3 + $0x10] sm:$0xff]  ;;  %v580_v14 = vld [vmem:[%s3143_s3 + $0x18] sm:$0xff]  ;;  %v581_v16 = vld [vmem:[%s3143_s3 + $0x20] sm:$0xff] }
  0x17   :  { %v2376_v15 = vpack.c.bf16 %v580_v14, %v579_v13  ;;  %v582_v17 = vld [vmem:[%s3143_s3 + $0x28] sm:$0xff]  ;;  %v53_v18 = vld [vmem:[%s3140_s0 + $0x38] sm:$0xff]  ;;  %v54_v19 = vld [vmem:[%s3140_s0 + $0x40] sm:$0xff] }
  0x18   :  { %2373 = vmatprep.subr.bf16.mxu1 %v2372_v12  ;;  %v2380_v20 = vpack.c.bf16 %v582_v17, %v581_v16  ;;  %v583_v21 = vld [vmem:[%s3143_s3 + $0x30] sm:$0xff]  ;;  %v584_v22 = vld [vmem:[%s3143_s3 + $0x38] sm:$0xff]  ;;  %v55_v23 = vld [vmem:[%s3140_s0 + $0x48] sm:$0xff] }
  0x19   :  { %2045 = vmatmul.mubr.msk.f32.vlgmr.msra.gmra.mrb[0].mxu0 %vm93_vm0, %v47_v4  ;;  %2375 = vmatpush3.bf16.msra.mxu1 %v2372_v12  ;;  %v56_v24 = vld [vmem:[%s3140_s0 + $0x50] sm:$0xff]  ;;  %v2384_v25 = vpack.c.bf16 %v584_v22, %v583_v21  ;;  %v585_v26 = vld [vmem:[%s3143_s3 + $0x40] sm:$0xff]  ;;  %v586_v27 = vld [vmem:[%s3143_s3 + $0x48] sm:$0xff] }
  0x1a   :  { %2047 = vmatprep.mubr.msk.f32.mxu0 %vm93_vm0, %v48_v5  ;;  %2377 = vmatprep.subr.bf16.mxu1 %v2376_v15  ;;  %v57_v28 = vld [vmem:[%s3140_s0 + $0x58] sm:$0xff]  ;;  %v58_v29 = vld [vmem:[%s3140_s0 + $0x60] sm:$0xff]  ;;  %v2388_v30 = vpack.c.bf16 %v586_v27, %v585_v26  ;;  %v587_v31 = vld [vmem:[%s3143_s3 + $0x50] sm:$0xff] }
  0x1b   :  { %v588_v32 = vld [vmem:[%s3143_s3 + $0x58] sm:$0xff]  ;;  %v59_v33 = vld [vmem:[%s3140_s0 + $0x68] sm:$0xff]  ;;  %v60_v34 = vld [vmem:[%s3140_s0 + $0x70] sm:$0xff] }
  0x1c   :  { %v2392_v35 = vpack.c.bf16 %v588_v32, %v587_v31  ;;  %v61_v36 = vld [vmem:[%s3140_s0 + $0x78] sm:$0xff]  ;;  %v62_v37 = vld [vmem:[%s3140_s0 + $0x80] sm:$0xff]  ;;  %v63_v38 = vld [vmem:[%s3140_s0 + $0x88] sm:$0xff] }
  0x1d   :  { %2048 = vmatmul.mubr.msk.f32.gmra.mrb[2].mxu0 %vm93_vm0, %v49_v6  ;;  %2379 = vmatpush3.bf16.msra.mxu1 %v2376_v15  ;;  %v64_v39 = vld [vmem:[%s3140_s0 + $0x90] sm:$0xff]  ;;  %v65_v40 = vld [vmem:[%s3140_s0 + $0x98] sm:$0xff]  ;;  %v66_v41 = vld [vmem:[%s3140_s0 + $0xa0] sm:$0xff] }
  0x1e   :  { %2050 = vmatprep.mubr.msk.f32.mxu0 %vm93_vm0, %v50_v7  ;;  %2381 = vmatprep.subr.bf16.mxu1 %v2380_v20  ;;  %v67_v42 = vld [vmem:[%s3140_s0 + $0xa8] sm:$0xff]  ;;  %v68_v43 = vld [vmem:[%s3140_s0 + $0xb0] sm:$0xff]  ;;  %v69_v44 = vld [vmem:[%s3140_s0 + $0xb8] sm:$0xff] }
  0x1f   :  { %v70_v45 = vld [vmem:[%s3140_s0 + $0xc0] sm:$0xff]  ;;  %v71_v46 = vld [vmem:[%s3140_s0 + $0xc8] sm:$0xff]  ;;  %v72_v47 = vld [vmem:[%s3140_s0 + $0xd0] sm:$0xff] }
  0x20   :  { %v73_v48 = vld [vmem:[%s3140_s0 + $0xd8] sm:$0xff]  ;;  %v74_v49 = vld [vmem:[%s3140_s0 + $0xe0] sm:$0xff]  ;;  %v75_v50 = vld [vmem:[%s3140_s0 + $0xe8] sm:$0xff] }
  0x21   :  { %2051 = vmatmul.mubr.msk.f32.gmra.mrb[4].mxu0 %vm93_vm0, %v51_v8  ;;  %2383 = vmatpush3.bf16.msra.mxu1 %v2380_v20  ;;  %v76_v51 = vld [vmem:[%s3140_s0 + $0xf0] sm:$0xff]  ;;  %v77_v52 = vld [vmem:[%s3140_s0 + $0xf8] sm:$0xff]  ;;  %v78_v53 = vld [vmem:[%s3140_s0 + $0x100] sm:$0xff] }
  0x22   :  { %2053 = vmatprep.mubr.msk.f32.mxu0 %vm93_vm0, %v52_v9  ;;  %2385 = vmatprep.subr.bf16.mxu1 %v2384_v25  ;;  %v79_v54 = vld [vmem:[%s3140_s0 + $0x108] sm:$0xff]  ;;  %v80_v55 = vld [vmem:[%s3140_s0 + $0x110] sm:$0xff]  ;;  %v81_v56 = vld [vmem:[%s3140_s0 + $0x118] sm:$0xff] }
  0x23   :  { %v82_v57 = vld [vmem:[%s3140_s0 + $0x120] sm:$0xff]  ;;  %v83_v58 = vld [vmem:[%s3140_s0 + $0x128] sm:$0xff]  ;;  %v591_v62 = vld [vmem:[%s3143_s3 + $0x70] sm:$0xff] }
  0x24   :  { %v589_v59 = vld [vmem:[%s3143_s3 + $0x60] sm:$0xff]  ;;  %v590_v60 = vld [vmem:[%s3143_s3 + $0x68] sm:$0xff]  ;;  %v592_v63 = vld [vmem:[%s3143_s3 + $0x78] sm:$0xff] }
  0x25   :  { %2054 = vmatmul.mubr.msk.f32.gmra.mrb[6].mxu0 %vm93_vm0, %v53_v18  ;;  %2387 = vmatpush3.bf16.msra.mxu1 %v2384_v25  ;;  %v2396_v61 = vpack.c.bf16 %v590_v60, %v589_v59  ;;  %v2400_v0 = vpack.c.bf16 %v592_v63, %v591_v62  ;;  %v969_v1 = vld [vmem:[%s3145_s5] sm:$0xff]  ;;  %v970_v2 = vld [vmem:[%s3145_s5 + $0x8] sm:$0xff]  ;;  %v971_v3 = vld [vmem:[%s3145_s5 + $0x10] sm:$0xff] }
  0x26   :  { %2056 = vmatprep.mubr.msk.f32.mxu0 %vm93_vm0, %v54_v19  ;;  %2389 = vmatprep.subr.bf16.mxu1 %v2388_v30  ;;  %v2404_v4 = vpack.c.bf16 %v970_v2, %v969_v1  ;;  %v972_v5 = vld [vmem:[%s3145_s5 + $0x18] sm:$0xff]  ;;  %v973_v7 = vld [vmem:[%s3145_s5 + $0x20] sm:$0xff]  ;;  %v974_v8 = vld [vmem:[%s3145_s5 + $0x28] sm:$0xff] }
  0x27   :  { %v2408_v6 = vpack.c.bf16 %v972_v5, %v971_v3  ;;  %v2412_v9 = vpack.c.bf16 %v974_v8, %v973_v7  ;;  %v975_v10 = vld [vmem:[%s3145_s5 + $0x30] sm:$0xff]  ;;  %v976_v11 = vld [vmem:[%s3145_s5 + $0x38] sm:$0xff]  ;;  %v977_v13 = vld [vmem:[%s3145_s5 + $0x40] sm:$0xff] }
  0x28   :  { %2405 = vmatprep.subr.bf16.mxu0 %v2404_v4  ;;  %v2416_v12 = vpack.c.bf16 %v976_v11, %v975_v10  ;;  %v978_v14 = vld [vmem:[%s3145_s5 + $0x48] sm:$0xff]  ;;  %v979_v16 = vld [vmem:[%s3145_s5 + $0x50] sm:$0xff]  ;;  %v980_v17 = vld [vmem:[%s3145_s5 + $0x58] sm:$0xff] }
  0x29   :  { %2057 = vmatmul.mubr.msk.f32.gmra.mrb[8].mxu0 %vm93_vm0, %v55_v23  ;;  %2391 = vmatpush3.bf16.msra.mxu1 %v2388_v30  ;;  %v2420_v15 = vpack.c.bf16 %v978_v14, %v977_v13  ;;  %v2424_v18 = vpack.c.bf16 %v980_v17, %v979_v16  ;;  %v981_v19 = vld [vmem:[%s3145_s5 + $0x60] sm:$0xff]  ;;  %v982_v20 = vld [vmem:[%s3145_s5 + $0x68] sm:$0xff]  ;;  %v983_v22 = vld [vmem:[%s3145_s5 + $0x70] sm:$0xff] }
  0x2a   :  { %2059 = vmatprep.mubr.msk.f32.mxu0 %vm93_vm0, %v56_v24  ;;  %2393 = vmatprep.subr.bf16.mxu1 %v2392_v35  ;;  %v2428_v21 = vpack.c.bf16 %v982_v20, %v981_v19  ;;  %v984_v23 = vld [vmem:[%s3145_s5 + $0x78] sm:$0xff]  ;;  %v2833_v25 = vld [vmem:[%s3142_s2] ss:$0 sm:$0xff] }
  0x2b   :  { %2407 = vmatpush3.bf16.msra.mxu0 %v2404_v4  ;;  %v2432_v24 = vpack.c.bf16 %v984_v23, %v983_v22 }
  0x2c   :  { %2409 = vmatprep.subr.bf16.mxu0 %v2408_v6 }
  0x2d   :  { %2060 = vmatmul.mubr.msk.f32.gmra.mrb[10].mxu0 %vm93_vm0, %v57_v28  ;;  %2395 = vmatpush3.bf16.msra.mxu1 %v2392_v35 }
  0x2e   :  { %2062 = vmatprep.mubr.msk.f32.mxu0 %vm93_vm0, %v58_v29  ;;  %2397 = vmatprep.subr.bf16.mxu1 %v2396_v61 }
  0x2f   :  { %2411 = vmatpush3.bf16.msra.mxu0 %v2408_v6 }
  0x30   :  { %2413 = vmatprep.subr.bf16.mxu0 %v2412_v9 }
  0x31   :  { %2063 = vmatmul.mubr.msk.f32.gmra.mrb[12].mxu0 %vm93_vm0, %v59_v33  ;;  %2399 = vmatpush3.bf16.msra.mxu1 %v2396_v61 }
  0x32   :  { %2065 = vmatprep.mubr.msk.f32.mxu0 %vm93_vm0, %v60_v34  ;;  %2401 = vmatprep.subr.bf16.mxu1 %v2400_v0 }
  0x33   :  { %2415 = vmatpush3.bf16.msra.mxu0 %v2412_v9 }
  0x34   :  { %2417 = vmatprep.subr.bf16.mxu0 %v2416_v12 }
  0x35   :  { %2066 = vmatmul.mubr.msk.f32.gmra.mrb[14].mxu0 %vm93_vm0, %v61_v36  ;;  %2403 = vmatpush3.bf16.msra.mxu1 %v2400_v0 }
  0x36   :  { %2068 = vmatprep.mubr.msk.f32.mxu0 %vm93_vm0, %v62_v37 }
  0x37   :  { %2419 = vmatpush3.bf16.msra.mxu0 %v2416_v12 }
  0x38   :  { %2421 = vmatprep.subr.bf16.mxu0 %v2420_v15 }
  0x39   :  { %2069 = vmatmul.mubr.msk.f32.gmra.mrb[16].mxu0 %vm93_vm0, %v63_v38 }
  0x3a   :  { %2071 = vmatprep.mubr.msk.f32.mxu0 %vm93_vm0, %v64_v39 }
  0x3b   :  { %2423 = vmatpush3.bf16.msra.mxu0 %v2420_v15 }
  0x3c   :  { %2425 = vmatprep.subr.bf16.mxu0 %v2424_v18 }
  0x3d   :  { %2072 = vmatmul.mubr.msk.f32.gmra.mrb[18].mxu0 %vm93_vm0, %v65_v40 }
  0x3e   :  { %2074 = vmatprep.mubr.msk.f32.mxu0 %vm93_vm0, %v66_v41 }
  0x3f   :  { %2427 = vmatpush3.bf16.msra.mxu0 %v2424_v18 }
  0x40   :  { %2429 = vmatprep.subr.bf16.mxu0 %v2428_v21 }
  0x41   :  { %2075 = vmatmul.mubr.msk.f32.gmra.mrb[20].mxu0 %vm93_vm0, %v67_v42 }
  0x42   :  { %2077 = vmatprep.mubr.msk.f32.mxu0 %vm93_vm0, %v68_v43 }
  0x43   :  { %2431 = vmatpush3.bf16.msra.mxu0 %v2428_v21 }
  0x44   :  { %2433 = vmatprep.subr.bf16.mxu0 %v2432_v24 }
  0x45   :  { %2078 = vmatmul.mubr.msk.f32.gmra.mrb[22].mxu0 %vm93_vm0, %v69_v44 }
  0x46   :  { %2080 = vmatprep.mubr.msk.f32.mxu0 %vm93_vm0, %v70_v45 }
  0x47   :  { %2435 = vmatpush3.bf16.msra.mxu0 %v2432_v24 }
  0x49   :  { %2081 = vmatmul.mubr.msk.f32.gmra.mrb[24].mxu0 %vm93_vm0, %v71_v46 }
  0x4a   :  { %2083 = vmatprep.mubr.msk.f32.mxu0 %vm93_vm0, %v72_v47 }
  0x4d   :  { %2084 = vmatmul.mubr.msk.f32.gmra.mrb[26].mxu0 %vm93_vm0, %v73_v48 }
  0x4e   :  { %2086 = vmatprep.mubr.msk.f32.mxu0 %vm93_vm0, %v74_v49 }
  0x51   :  { %2087 = vmatmul.mubr.msk.f32.gmra.mrb[28].mxu0 %vm93_vm0, %v75_v50 }
  0x52   :  { %2089 = vmatprep.mubr.msk.f32.mxu0 %vm93_vm0, %v76_v51 }
  0x55   :  { %2090 = vmatmul.mubr.msk.f32.gmra.mrb[30].mxu0 %vm93_vm0, %v77_v52 }
  0x56   :  { %2092 = vmatprep.mubr.msk.f32.mxu0 %vm93_vm0, %v78_v53 }
  0x59   :  { %2093 = vmatmul.mubr.msk.f32.gmra.mrb[32].mxu0 %vm93_vm0, %v79_v54 }
  0x5a   :  { %2095 = vmatprep.mubr.msk.f32.mxu0 %vm93_vm0, %v80_v55 }
  0x5d   :  { %2096 = vmatmul.mubr.msk.f32.gmra.mrb[34].mxu0 %vm93_vm0, %v81_v56 }
  0x5e   :  { %2098 = vmatprep.mubr.msk.f32.mxu0 %vm93_vm0, %v82_v57 }
  0x61   :  { %2099 = vmatmul.mubr.msk.f32.gmra.mrb[36].mxu0 %vm93_vm0, %v83_v58 }
  0xec   :  { %v2046_v26 = vpop.f32.mrb[0].mxu0 }
  0xed   :  { %v280_v27 = vadd.f32 %v2046_v26, %v2833_v25  ;;  %v274_v28 = vpop.f32.mrb[1].mxu0 }
  0xee   :  { %v275_v29 = vadd.f32 %v2833_v25, %v274_v28 }
  0xef   :  { %v502_v30 = vmul.f32 0.01, %v280_v27  ;;  %vm464_vm2 = vcmp.gt.f32.partialorder %v280_v27, 0.0 }
  0xf0   :  { %v2049_v31 = vpop.f32.mrb[2].mxu0  ;;  %vm463_vm1 = vcmp.gt.f32.partialorder %v275_v29, 0.0  ;;  %v501_v32 = vmul.f32 0.01, %v275_v29 }
  0xf1   :  { %v290_v33 = vadd.f32 %v2049_v31, %v2833_v25  ;;  %v284_v34 = vpop.f32.mrb[3].mxu0  ;;  %v540_v38 = vsel %vm464_vm2, %v280_v27, %v502_v30 }
  0xf2   :  { %v285_v35 = vadd.f32 %v2833_v25, %v284_v34  ;;  %v539_v36 = vsel %vm463_vm1, %v275_v29, %v501_v32 }
  0xf3   :  { %v504_v37 = vmul.f32 0.01, %v290_v33  ;;  %2133 = vmatprep.mubr.f32.mxu1 %v539_v36  ;;  %vm466_vm4 = vcmp.gt.f32.partialorder %v290_v33, 0.0 }
  0xf4   :  { %v503_v39 = vmul.f32 0.01, %v285_v35  ;;  %v2052_v40 = vpop.f32.mrb[4].mxu0  ;;  %2134 = vmatmul.mubr.f32.vlgmr.msra.gmra.mrb[0].mxu1 %v540_v38  ;;  %vm465_vm3 = vcmp.gt.f32.partialorder %v285_v35, 0.0 }
  0xf5   :  { %v300_v41 = vadd.f32 %v2052_v40, %v2833_v25  ;;  %v294_v42 = vpop.f32.mrb[5].mxu0  ;;  %v542_v46 = vsel %vm466_vm4, %v290_v33, %v504_v37 }
  0xf6   :  { %v295_v43 = vadd.f32 %v2833_v25, %v294_v42  ;;  %v541_v44 = vsel %vm465_vm3, %v285_v35, %v503_v39 }
  0xf7   :  { %v506_v45 = vmul.f32 0.01, %v300_v41  ;;  %2136 = vmatprep.mubr.f32.mxu1 %v541_v44  ;;  %vm468_vm6 = vcmp.gt.f32.partialorder %v300_v41, 0.0 }
  0xf8   :  { %v505_v47 = vmul.f32 0.01, %v295_v43  ;;  %v2055_v48 = vpop.f32.mrb[6].mxu0  ;;  %2137 = vmatmul.mubr.f32.gmra.mrb[2].mxu1 %v542_v46  ;;  %vm467_vm5 = vcmp.gt.f32.partialorder %v295_v43, 0.0 }
  0xf9   :  { %v310_v49 = vadd.f32 %v2055_v48, %v2833_v25  ;;  %v304_v50 = vpop.f32.mrb[7].mxu0  ;;  %v544_v54 = vsel %vm468_vm6, %v300_v41, %v506_v45 }
  0xfa   :  { %v305_v51 = vadd.f32 %v2833_v25, %v304_v50  ;;  %v543_v52 = vsel %vm467_vm5, %v295_v43, %v505_v47 }
  0xfb   :  { %v508_v53 = vmul.f32 0.01, %v310_v49  ;;  %2139 = vmatprep.mubr.f32.mxu1 %v543_v52  ;;  %vm470_vm8 = vcmp.gt.f32.partialorder %v310_v49, 0.0 }
  0xfc   :  { %v507_v55 = vmul.f32 0.01, %v305_v51  ;;  %v2058_v56 = vpop.f32.mrb[8].mxu0  ;;  %2140 = vmatmul.mubr.f32.gmra.mrb[4].mxu1 %v544_v54  ;;  %vm469_vm7 = vcmp.gt.f32.partialorder %v305_v51, 0.0 }
  0xfd   :  { %v320_v57 = vadd.f32 %v2058_v56, %v2833_v25  ;;  %v314_v58 = vpop.f32.mrb[9].mxu0  ;;  %v546_v62 = vsel %vm470_vm8, %v310_v49, %v508_v53 }
  0xfe   :  { %v315_v59 = vadd.f32 %v2833_v25, %v314_v58  ;;  %v545_v60 = vsel %vm469_vm7, %v305_v51, %v507_v55 }
  0xff   :  { %v510_v61 = vmul.f32 0.01, %v320_v57  ;;  %2142 = vmatprep.mubr.f32.mxu1 %v545_v60  ;;  %vm472_vm10 = vcmp.gt.f32.partialorder %v320_v57, 0.0 }
 0x100   :  { %v509_v63 = vmul.f32 0.01, %v315_v59  ;;  %v2061_v0 = vpop.f32.mrb[10].mxu0  ;;  %2143 = vmatmul.mubr.f32.gmra.mrb[6].mxu1 %v546_v62  ;;  %vm471_vm9 = vcmp.gt.f32.partialorder %v315_v59, 0.0 }
 0x101   :  { %v330_v1 = vadd.f32 %v2061_v0, %v2833_v25  ;;  %v324_v2 = vpop.f32.mrb[11].mxu0  ;;  %v548_v6 = vsel %vm472_vm10, %v320_v57, %v510_v61 }
 0x102   :  { %v325_v3 = vadd.f32 %v2833_v25, %v324_v2  ;;  %v547_v4 = vsel %vm471_vm9, %v315_v59, %v509_v63 }
 0x103   :  { %v512_v5 = vmul.f32 0.01, %v330_v1  ;;  %2145 = vmatprep.mubr.f32.mxu1 %v547_v4  ;;  %vm474_vm12 = vcmp.gt.f32.partialorder %v330_v1, 0.0 }
 0x104   :  { %v511_v7 = vmul.f32 0.01, %v325_v3  ;;  %v2064_v8 = vpop.f32.mrb[12].mxu0  ;;  %2146 = vmatmul.mubr.f32.gmra.mrb[8].mxu1 %v548_v6  ;;  %vm473_vm11 = vcmp.gt.f32.partialorder %v325_v3, 0.0 }
 0x105   :  { %v340_v9 = vadd.f32 %v2064_v8, %v2833_v25  ;;  %v334_v10 = vpop.f32.mrb[13].mxu0  ;;  %v550_v14 = vsel %vm474_vm12, %v330_v1, %v512_v5 }
 0x106   :  { %v335_v11 = vadd.f32 %v2833_v25, %v334_v10  ;;  %v549_v12 = vsel %vm473_vm11, %v325_v3, %v511_v7 }
 0x107   :  { %v514_v13 = vmul.f32 0.01, %v340_v9  ;;  %2148 = vmatprep.mubr.f32.mxu1 %v549_v12  ;;  %vm476_vm14 = vcmp.gt.f32.partialorder %v340_v9, 0.0 }
 0x108   :  { %v513_v15 = vmul.f32 0.01, %v335_v11  ;;  %v2067_v16 = vpop.f32.mrb[14].mxu0  ;;  %2149 = vmatmul.mubr.f32.gmra.mrb[10].mxu1 %v550_v14  ;;  %vm475_vm13 = vcmp.gt.f32.partialorder %v335_v11, 0.0 }
 0x109   :  { %v350_v17 = vadd.f32 %v2067_v16, %v2833_v25  ;;  %v344_v18 = vpop.f32.mrb[15].mxu0  ;;  %v552_v22 = vsel %vm476_vm14, %v340_v9, %v514_v13 }
 0x10a   :  { %v345_v19 = vadd.f32 %v2833_v25, %v344_v18  ;;  %v551_v20 = vsel %vm475_vm13, %v335_v11, %v513_v15 }
 0x10b   :  { %v516_v21 = vmul.f32 0.01, %v350_v17  ;;  %2151 = vmatprep.mubr.f32.mxu1 %v551_v20  ;;  %vm478_vm0 = vcmp.gt.f32.partialorder %v350_v17, 0.0 }
 0x10c   :  { %v515_v23 = vmul.f32 0.01, %v345_v19  ;;  %v2070_v24 = vpop.f32.mrb[16].mxu0  ;;  %2152 = vmatmul.mubr.f32.gmra.mrb[12].mxu1 %v552_v22  ;;  %vm477_vm15 = vcmp.gt.f32.partialorder %v345_v19, 0.0 }
 0x10d   :  { %v360_v26 = vadd.f32 %v2070_v24, %v2833_v25  ;;  %v354_v27 = vpop.f32.mrb[17].mxu0  ;;  %v554_v31 = vsel %vm478_vm0, %v350_v17, %v516_v21 }
 0x10e   :  { %v355_v28 = vadd.f32 %v2833_v25, %v354_v27  ;;  %v553_v29 = vsel %vm477_vm15, %v345_v19, %v515_v23 }
 0x10f   :  { %v518_v30 = vmul.f32 0.01, %v360_v26  ;;  %2154 = vmatprep.mubr.f32.mxu1 %v553_v29  ;;  %vm480_vm2 = vcmp.gt.f32.partialorder %v360_v26, 0.0 }
 0x110   :  { %v517_v32 = vmul.f32 0.01, %v355_v28  ;;  %v2073_v33 = vpop.f32.mrb[18].mxu0  ;;  %2155 = vmatmul.mubr.f32.gmra.mrb[14].mxu1 %v554_v31  ;;  %vm479_vm1 = vcmp.gt.f32.partialorder %v355_v28, 0.0 }
 0x111   :  { %v370_v34 = vadd.f32 %v2073_v33, %v2833_v25  ;;  %v364_v35 = vpop.f32.mrb[19].mxu0  ;;  %v556_v39 = vsel %vm480_vm2, %v360_v26, %v518_v30 }
 0x112   :  { %v365_v36 = vadd.f32 %v2833_v25, %v364_v35  ;;  %v555_v37 = vsel %vm479_vm1, %v355_v28, %v517_v32 }
 0x113   :  { %v520_v38 = vmul.f32 0.01, %v370_v34  ;;  %2157 = vmatprep.mubr.f32.mxu1 %v555_v37  ;;  %vm482_vm4 = vcmp.gt.f32.partialorder %v370_v34, 0.0 }
 0x114   :  { %v519_v40 = vmul.f32 0.01, %v365_v36  ;;  %v2076_v41 = vpop.f32.mrb[20].mxu0  ;;  %2158 = vmatmul.mubr.f32.gmra.mrb[16].mxu1 %v556_v39  ;;  %vm481_vm3 = vcmp.gt.f32.partialorder %v365_v36, 0.0 }
 0x115   :  { %v380_v42 = vadd.f32 %v2076_v41, %v2833_v25  ;;  %v374_v43 = vpop.f32.mrb[21].mxu0  ;;  %v558_v47 = vsel %vm482_vm4, %v370_v34, %v520_v38 }
 0x116   :  { %v375_v44 = vadd.f32 %v2833_v25, %v374_v43  ;;  %v557_v45 = vsel %vm481_vm3, %v365_v36, %v519_v40 }
 0x117   :  { %v522_v46 = vmul.f32 0.01, %v380_v42  ;;  %2160 = vmatprep.mubr.f32.mxu1 %v557_v45  ;;  %vm484_vm6 = vcmp.gt.f32.partialorder %v380_v42, 0.0 }
 0x118   :  { %v521_v48 = vmul.f32 0.01, %v375_v44  ;;  %v2079_v49 = vpop.f32.mrb[22].mxu0  ;;  %2161 = vmatmul.mubr.f32.gmra.mrb[18].mxu1 %v558_v47  ;;  %vm483_vm5 = vcmp.gt.f32.partialorder %v375_v44, 0.0 }
 0x119   :  { %v390_v50 = vadd.f32 %v2079_v49, %v2833_v25  ;;  %v384_v51 = vpop.f32.mrb[23].mxu0  ;;  %v560_v55 = vsel %vm484_vm6, %v380_v42, %v522_v46 }
 0x11a   :  { %v385_v52 = vadd.f32 %v2833_v25, %v384_v51  ;;  %v559_v53 = vsel %vm483_vm5, %v375_v44, %v521_v48 }
 0x11b   :  { %v524_v54 = vmul.f32 0.01, %v390_v50  ;;  %2163 = vmatprep.mubr.f32.mxu1 %v559_v53  ;;  %vm486_vm8 = vcmp.gt.f32.partialorder %v390_v50, 0.0  ;;  %v1362_v53 = vld [vmem:[#allocation2 + $0x8] sm:$0xff] }
 0x11c   :  { %v523_v56 = vmul.f32 0.01, %v385_v52  ;;  %v2082_v57 = vpop.f32.mrb[24].mxu0  ;;  %2164 = vmatmul.mubr.f32.gmra.mrb[20].mxu1 %v560_v55  ;;  %vm485_vm7 = vcmp.gt.f32.partialorder %v385_v52, 0.0 }
 0x11d   :  { %v400_v58 = vadd.f32 %v2082_v57, %v2833_v25  ;;  %v394_v59 = vpop.f32.mrb[25].mxu0  ;;  %v562_v63 = vsel %vm486_vm8, %v390_v50, %v524_v54  ;;  %v1363_v54 = vld [vmem:[#allocation2 + $0x10] sm:$0xff] }
 0x11e   :  { %v395_v60 = vadd.f32 %v2833_v25, %v394_v59  ;;  %v561_v61 = vsel %vm485_vm7, %v385_v52, %v523_v56  ;;  %v1361_v52 = vld [vmem:[#allocation2] sm:$0xff]  ;;  %v1364_v56 = vld [vmem:[#allocation2 + $0x18] sm:$0xff] }
 0x11f   :  { %v526_v62 = vmul.f32 0.01, %v400_v58  ;;  %2166 = vmatprep.mubr.f32.mxu1 %v561_v61  ;;  %vm488_vm10 = vcmp.gt.f32.partialorder %v400_v58, 0.0  ;;  %v2436_v55 = vpack.c.bf16 %v1362_v53, %v1361_v52  ;;  %v2440_v57 = vpack.c.bf16 %v1364_v56, %v1363_v54  ;;  %v1368_v61 = vld [vmem:[#allocation2 + $0x38] sm:$0xff] }
 0x120   :  { %v525_v0 = vmul.f32 0.01, %v395_v60  ;;  %v2085_v1 = vpop.f32.mrb[26].mxu0  ;;  %2167 = vmatmul.mubr.f32.gmra.mrb[22].mxu1 %v562_v63  ;;  %vm487_vm9 = vcmp.gt.f32.partialorder %v395_v60, 0.0  ;;  %v1369_v63 = vld [vmem:[#allocation2 + $0x40] sm:$0xff] }
 0x121   :  { %v410_v2 = vadd.f32 %v2085_v1, %v2833_v25  ;;  %v404_v3 = vpop.f32.mrb[27].mxu0  ;;  %v564_v7 = vsel %vm488_vm10, %v400_v58, %v526_v62  ;;  %2468 = vmatprep.subr.bf16.mxu1 %v2436_v55  ;;  %2437 = vmatprep.subr.bf16.mxu0 %v2436_v55  ;;  %v1366_v58 = vld [vmem:[#allocation2 + $0x28] sm:$0xff] }
 0x122   :  { %v405_v4 = vadd.f32 %v2833_v25, %v404_v3  ;;  %v563_v5 = vsel %vm487_vm9, %v395_v60, %v525_v0  ;;  %2476 = vmatpush3.bf16.msra.mxu1 %v2436_v55  ;;  %v1367_v60 = vld [vmem:[#allocation2 + $0x30] sm:$0xff]  ;;  %v1370_v0 = vld [vmem:[#allocation2 + $0x48] sm:$0xff]  ;;  %v1372_v3 = vld [vmem:[#allocation2 + $0x58] sm:$0xff] }
 0x123   :  { %v528_v6 = vmul.f32 0.01, %v410_v2  ;;  %2169 = vmatprep.mubr.f32.mxu1 %v563_v5  ;;  %vm490_vm12 = vcmp.gt.f32.partialorder %v410_v2, 0.0  ;;  %2469 = vmatprep.subr.bf16.mxu1 %v2440_v57  ;;  %v2876_v62 = vpack.c.bf16 %v1368_v61, %v1367_v60  ;;  %v2880_v1 = vpack.c.bf16 %v1370_v0, %v1369_v63  ;;  %v2892_v5 = vld [vmem:[%s3144_s4] ss:$0 sm:$0xff] }
 0x124   :  { %v527_v8 = vmul.f32 0.01, %v405_v4  ;;  %v2088_v9 = vpop.f32.mrb[28].mxu0  ;;  %2170 = vmatmul.mubr.f32.gmra.mrb[24].mxu1 %v564_v7  ;;  %vm489_vm11 = vcmp.gt.f32.partialorder %v405_v4, 0.0 }
 0x125   :  { %v420_v10 = vadd.f32 %v2088_v9, %v2833_v25  ;;  %v414_v11 = vpop.f32.mrb[29].mxu0  ;;  %v566_v15 = vsel %vm490_vm12, %v410_v2, %v528_v6  ;;  %v1371_v2 = vld [vmem:[#allocation2 + $0x50] sm:$0xff] }
 0x126   :  { %v415_v12 = vadd.f32 %v2833_v25, %v414_v11  ;;  %v565_v13 = vsel %vm489_vm11, %v405_v4, %v527_v8  ;;  %2477 = vmatpush3.bf16.msra.mxu1 %v2440_v57  ;;  %v2884_v4 = vpack.c.bf16 %v1372_v3, %v1371_v2 }
 0x127   :  { %v530_v14 = vmul.f32 0.01, %v420_v10  ;;  %2172 = vmatprep.mubr.f32.mxu1 %v565_v13  ;;  %vm492_vm14 = vcmp.gt.f32.partialorder %v420_v10, 0.0 }
 0x128   :  { %v529_v16 = vmul.f32 0.01, %v415_v12  ;;  %v2091_v17 = vpop.f32.mrb[30].mxu0  ;;  %2173 = vmatmul.mubr.f32.gmra.mrb[26].mxu1 %v566_v15  ;;  %vm491_vm13 = vcmp.gt.f32.partialorder %v415_v12, 0.0 }
 0x129   :  { %v430_v18 = vadd.f32 %v2091_v17, %v2833_v25  ;;  %v424_v19 = vpop.f32.mrb[31].mxu0  ;;  %v568_v23 = vsel %vm492_vm14, %v420_v10, %v530_v14 }
 0x12a   :  { %v425_v20 = vadd.f32 %v2833_v25, %v424_v19  ;;  %v567_v21 = vsel %vm491_vm13, %v415_v12, %v529_v16 }
 0x12b   :  { %v532_v22 = vmul.f32 0.01, %v430_v18  ;;  %2175 = vmatprep.mubr.f32.mxu1 %v567_v21  ;;  %vm494_vm0 = vcmp.gt.f32.partialorder %v430_v18, 0.0 }
 0x12c   :  { %v531_v24 = vmul.f32 0.01, %v425_v20  ;;  %v2094_v26 = vpop.f32.mrb[32].mxu0  ;;  %2176 = vmatmul.mubr.f32.gmra.mrb[28].mxu1 %v568_v23  ;;  %vm493_vm15 = vcmp.gt.f32.partialorder %v425_v20, 0.0 }
 0x12d   :  { %v440_v27 = vadd.f32 %v2094_v26, %v2833_v25  ;;  %v434_v28 = vpop.f32.mrb[33].mxu0  ;;  %v570_v32 = vsel %vm494_vm0, %v430_v18, %v532_v22 }
 0x12e   :  { %v435_v29 = vadd.f32 %v2833_v25, %v434_v28  ;;  %v569_v30 = vsel %vm493_vm15, %v425_v20, %v531_v24 }
 0x12f   :  { %v534_v31 = vmul.f32 0.01, %v440_v27  ;;  %2178 = vmatprep.mubr.f32.mxu1 %v569_v30  ;;  %vm496_vm2 = vcmp.gt.f32.partialorder %v440_v27, 0.0 }
 0x130   :  { %v533_v33 = vmul.f32 0.01, %v435_v29  ;;  %v2097_v34 = vpop.f32.mrb[34].mxu0  ;;  %2179 = vmatmul.mubr.f32.gmra.mrb[30].mxu1 %v570_v32  ;;  %vm495_vm1 = vcmp.gt.f32.partialorder %v435_v29, 0.0 }
 0x131   :  { %v450_v35 = vadd.f32 %v2097_v34, %v2833_v25  ;;  %v444_v36 = vpop.f32.mrb[35].mxu0  ;;  %v572_v40 = vsel %vm496_vm2, %v440_v27, %v534_v31 }
 0x132   :  { %v445_v37 = vadd.f32 %v2833_v25, %v444_v36  ;;  %v571_v38 = vsel %vm495_vm1, %v435_v29, %v533_v33 }
 0x133   :  { %v536_v39 = vmul.f32 0.01, %v450_v35  ;;  %2181 = vmatprep.mubr.f32.mxu1 %v571_v38  ;;  %vm498_vm4 = vcmp.gt.f32.partialorder %v450_v35, 0.0 }
 0x134   :  { %v535_v41 = vmul.f32 0.01, %v445_v37  ;;  %v2100_v42 = vpop.f32.mrb[36].mxu0  ;;  %2182 = vmatmul.mubr.f32.gmra.mrb[32].mxu1 %v572_v40  ;;  %vm497_vm3 = vcmp.gt.f32.partialorder %v445_v37, 0.0 }
 0x135   :  { %v460_v43 = vadd.f32 %v2100_v42, %v2833_v25  ;;  %v454_v44 = vpop.f32.mrb[37].mxu0  ;;  %v574_v48 = vsel %vm498_vm4, %v450_v35, %v536_v39 }
 0x136   :  { %v455_v45 = vadd.f32 %v2833_v25, %v454_v44  ;;  %v573_v46 = vsel %vm497_vm3, %v445_v37, %v535_v41  ;;  %v1365_v25 = vld [vmem:[#allocation2 + $0x20] sm:$0xff] }
 0x137   :  { %v538_v47 = vmul.f32 0.01, %v460_v43  ;;  %2184 = vmatprep.mubr.f32.mxu1 %v573_v46  ;;  %vm500_vm6 = vcmp.gt.f32.partialorder %v460_v43, 0.0  ;;  %v2873_v59 = vpack.c.bf16 %v1366_v58, %v1365_v25 }
 0x138   :  { %v537_v49 = vmul.f32 0.01, %v455_v45  ;;  %2185 = vmatmul.mubr.f32.gmra.mrb[34].mxu1 %v574_v48  ;;  %vm499_vm5 = vcmp.gt.f32.partialorder %v455_v45, 0.0 }
 0x139   :  { %v576_v51 = vsel %vm500_vm6, %v460_v43, %v538_v47  ;;  %2470 = vmatprep.subr.bf16.mxu1 %v2873_v59 }
 0x13a   :  { %v575_v50 = vsel %vm499_vm5, %v455_v45, %v537_v49  ;;  %2478 = vmatpush3.bf16.msra.mxu1 %v2873_v59 }
 0x13b   :  { %2187 = vmatprep.mubr.f32.mxu1 %v575_v50  ;;  %2471 = vmatprep.subr.bf16.mxu1 %v2876_v62 }
 0x13c   :  { %2188 = vmatmul.mubr.f32.gmra.mrb[36].mxu1 %v576_v51 }
 0x13e   :  { %2479 = vmatpush3.bf16.msra.mxu1 %v2876_v62 }
 0x13f   :  { %2472 = vmatprep.subr.bf16.mxu1 %v2880_v1 }
 0x142   :  { %2480 = vmatpush3.bf16.msra.mxu1 %v2880_v1 }
 0x143   :  { %2473 = vmatprep.subr.bf16.mxu1 %v2884_v4 }
 0x146   :  { %2481 = vmatpush3.bf16.msra.mxu1 %v2884_v4 }
 0x1c7   :  { %v2135_v6 = vpop.f32.mrb[0].mxu1 }
 0x1c8   :  { %v672_v7 = vadd.f32 %v2135_v6, %v2892_v5  ;;  %v666_v8 = vpop.f32.mrb[1].mxu1 }
 0x1c9   :  { %v667_v9 = vadd.f32 %v2892_v5, %v666_v8 }
 0x1ca   :  { %v894_v10 = vmul.f32 0.01, %v672_v7  ;;  %vm856_vm7 = vcmp.gt.f32.partialorder %v672_v7, 0.0 }
 0x1cb   :  { %v893_v11 = vmul.f32 0.01, %v667_v9  ;;  %v2138_v12 = vpop.f32.mrb[2].mxu1  ;;  %vm855_vm8 = vcmp.gt.f32.partialorder %v667_v9, 0.0 }
 0x1cc   :  { %v682_v13 = vadd.f32 %v2138_v12, %v2892_v5  ;;  %v676_v14 = vpop.f32.mrb[3].mxu1  ;;  %v932_v17 = vsel %vm856_vm7, %v672_v7, %v894_v10 }
 0x1cd   :  { %v677_v15 = vadd.f32 %v2892_v5, %v676_v14  ;;  %v931_v16 = vsel %vm855_vm8, %v667_v9, %v893_v11 }
 0x1ce   :  { %v896_v18 = vmul.f32 0.01, %v682_v13  ;;  %2222 = vmatprep.mubr.f32.mxu0 %v931_v16  ;;  %vm858_vm10 = vcmp.gt.f32.partialorder %v682_v13, 0.0 }
 0x1cf   :  { %v895_v19 = vmul.f32 0.01, %v677_v15  ;;  %v2141_v20 = vpop.f32.mrb[4].mxu1  ;;  %2223 = vmatmul.mubr.f32.vlgmr.msra.gmra.mrb[38].mxu0 %v932_v17  ;;  %vm857_vm9 = vcmp.gt.f32.partialorder %v677_v15, 0.0 }
 0x1d0   :  { %v692_v21 = vadd.f32 %v2141_v20, %v2892_v5  ;;  %v686_v22 = vpop.f32.mrb[5].mxu1  ;;  %2439 = vmatpush3.bf16.msra.mxu0 %v2436_v55  ;;  %v934_v27 = vsel %vm858_vm10, %v682_v13, %v896_v18 }
 0x1d1   :  { %v687_v23 = vadd.f32 %v2892_v5, %v686_v22  ;;  %v933_v24 = vsel %vm857_vm9, %v677_v15, %v895_v19  ;;  %2441 = vmatprep.subr.bf16.mxu0 %v2440_v57 }
 0x1d2   :  { %v898_v26 = vmul.f32 0.01, %v692_v21  ;;  %2225 = vmatprep.mubr.f32.mxu0 %v933_v24  ;;  %vm860_vm12 = vcmp.gt.f32.partialorder %v692_v21, 0.0 }
 0x1d3   :  { %v897_v28 = vmul.f32 0.01, %v687_v23  ;;  %v2144_v29 = vpop.f32.mrb[6].mxu1  ;;  %2226 = vmatmul.mubr.f32.gmra.mrb[40].mxu0 %v934_v27  ;;  %vm859_vm11 = vcmp.gt.f32.partialorder %v687_v23, 0.0 }
 0x1d4   :  { %v702_v30 = vadd.f32 %v2144_v29, %v2892_v5  ;;  %v696_v31 = vpop.f32.mrb[7].mxu1  ;;  %2443 = vmatpush3.bf16.msra.mxu0 %v2440_v57  ;;  %v936_v35 = vsel %vm860_vm12, %v692_v21, %v898_v26 }
 0x1d5   :  { %v697_v32 = vadd.f32 %v2892_v5, %v696_v31  ;;  %v935_v33 = vsel %vm859_vm11, %v687_v23, %v897_v28  ;;  %2445 = vmatprep.subr.bf16.mxu0 %v2873_v59 }
 0x1d6   :  { %v900_v34 = vmul.f32 0.01, %v702_v30  ;;  %2228 = vmatprep.mubr.f32.mxu0 %v935_v33  ;;  %vm862_vm14 = vcmp.gt.f32.partialorder %v702_v30, 0.0 }
 0x1d7   :  { %v899_v36 = vmul.f32 0.01, %v697_v32  ;;  %v2147_v37 = vpop.f32.mrb[8].mxu1  ;;  %2229 = vmatmul.mubr.f32.gmra.mrb[42].mxu0 %v936_v35  ;;  %vm861_vm13 = vcmp.gt.f32.partialorder %v697_v32, 0.0 }
 0x1d8   :  { %v712_v38 = vadd.f32 %v2147_v37, %v2892_v5  ;;  %v706_v39 = vpop.f32.mrb[9].mxu1  ;;  %2447 = vmatpush3.bf16.msra.mxu0 %v2873_v59  ;;  %v938_v43 = vsel %vm862_vm14, %v702_v30, %v900_v34 }
 0x1d9   :  { %v707_v40 = vadd.f32 %v2892_v5, %v706_v39  ;;  %v937_v41 = vsel %vm861_vm13, %v697_v32, %v899_v36  ;;  %2449 = vmatprep.subr.bf16.mxu0 %v2876_v62 }
 0x1da   :  { %v902_v42 = vmul.f32 0.01, %v712_v38  ;;  %2231 = vmatprep.mubr.f32.mxu0 %v937_v41  ;;  %vm864_vm0 = vcmp.gt.f32.partialorder %v712_v38, 0.0 }
 0x1db   :  { %v901_v44 = vmul.f32 0.01, %v707_v40  ;;  %v2150_v45 = vpop.f32.mrb[10].mxu1  ;;  %2232 = vmatmul.mubr.f32.gmra.mrb[44].mxu0 %v938_v43  ;;  %vm863_vm15 = vcmp.gt.f32.partialorder %v707_v40, 0.0 }
 0x1dc   :  { %v722_v46 = vadd.f32 %v2150_v45, %v2892_v5  ;;  %v716_v47 = vpop.f32.mrb[11].mxu1  ;;  %2451 = vmatpush3.bf16.msra.mxu0 %v2876_v62  ;;  %v940_v51 = vsel %vm864_vm0, %v712_v38, %v902_v42 }
 0x1dd   :  { %v717_v48 = vadd.f32 %v2892_v5, %v716_v47  ;;  %v939_v49 = vsel %vm863_vm15, %v707_v40, %v901_v44  ;;  %2453 = vmatprep.subr.bf16.mxu0 %v2880_v1 }
 0x1de   :  { %v904_v50 = vmul.f32 0.01, %v722_v46  ;;  %2234 = vmatprep.mubr.f32.mxu0 %v939_v49  ;;  %vm866_vm2 = vcmp.gt.f32.partialorder %v722_v46, 0.0 }
 0x1df   :  { %v903_v52 = vmul.f32 0.01, %v717_v48  ;;  %v2153_v53 = vpop.f32.mrb[12].mxu1  ;;  %2235 = vmatmul.mubr.f32.gmra.mrb[46].mxu0 %v940_v51  ;;  %vm865_vm1 = vcmp.gt.f32.partialorder %v717_v48, 0.0 }
 0x1e0   :  { %v732_v54 = vadd.f32 %v2153_v53, %v2892_v5  ;;  %v726_v55 = vpop.f32.mrb[13].mxu1  ;;  %2455 = vmatpush3.bf16.msra.mxu0 %v2880_v1  ;;  %v942_v58 = vsel %vm866_vm2, %v722_v46, %v904_v50 }
 0x1e1   :  { %v727_v56 = vadd.f32 %v2892_v5, %v726_v55  ;;  %v941_v57 = vsel %vm865_vm1, %v717_v48, %v903_v52  ;;  %2457 = vmatprep.subr.bf16.mxu0 %v2884_v4 }
 0x1e2   :  { %v906_v25 = vmul.f32 0.01, %v732_v54  ;;  %2237 = vmatprep.mubr.f32.mxu0 %v941_v57  ;;  %vm868_vm4 = vcmp.gt.f32.partialorder %v732_v54, 0.0 }
 0x1e3   :  { %v905_v59 = vmul.f32 0.01, %v727_v56  ;;  %v2156_v60 = vpop.f32.mrb[14].mxu1  ;;  %2238 = vmatmul.mubr.f32.gmra.mrb[48].mxu0 %v942_v58  ;;  %vm867_vm3 = vcmp.gt.f32.partialorder %v727_v56, 0.0 }
 0x1e4   :  { %v742_v61 = vadd.f32 %v2156_v60, %v2892_v5  ;;  %v736_v62 = vpop.f32.mrb[15].mxu1  ;;  %2459 = vmatpush3.bf16.msra.mxu0 %v2884_v4  ;;  %v944_v2 = vsel %vm868_vm4, %v732_v54, %v906_v25 }
 0x1e5   :  { %v737_v63 = vadd.f32 %v2892_v5, %v736_v62  ;;  %v943_v0 = vsel %vm867_vm3, %v727_v56, %v905_v59 }
 0x1e6   :  { %v908_v1 = vmul.f32 0.01, %v742_v61  ;;  %2240 = vmatprep.mubr.f32.mxu0 %v943_v0  ;;  %vm870_vm6 = vcmp.gt.f32.partialorder %v742_v61, 0.0 }
 0x1e7   :  { %v907_v3 = vmul.f32 0.01, %v737_v63  ;;  %v2159_v6 = vpop.f32.mrb[16].mxu1  ;;  %2241 = vmatmul.mubr.f32.gmra.mrb[50].mxu0 %v944_v2  ;;  %vm869_vm5 = vcmp.gt.f32.partialorder %v737_v63, 0.0 }
 0x1e8   :  { %v752_v7 = vadd.f32 %v2159_v6, %v2892_v5  ;;  %v746_v8 = vpop.f32.mrb[17].mxu1  ;;  %v946_v4 = vsel %vm870_vm6, %v742_v61, %v908_v1 }
 0x1e9   :  { %v747_v9 = vadd.f32 %v2892_v5, %v746_v8  ;;  %v945_v10 = vsel %vm869_vm5, %v737_v63, %v907_v3 }
 0x1ea   :  { %v910_v11 = vmul.f32 0.01, %v752_v7  ;;  %2243 = vmatprep.mubr.f32.mxu0 %v945_v10  ;;  %vm872_vm8 = vcmp.gt.f32.partialorder %v752_v7, 0.0 }
 0x1eb   :  { %v909_v12 = vmul.f32 0.01, %v747_v9  ;;  %v2162_v13 = vpop.f32.mrb[18].mxu1  ;;  %2244 = vmatmul.mubr.f32.gmra.mrb[52].mxu0 %v946_v4  ;;  %vm871_vm7 = vcmp.gt.f32.partialorder %v747_v9, 0.0 }
 0x1ec   :  { %v762_v14 = vadd.f32 %v2162_v13, %v2892_v5  ;;  %v756_v15 = vpop.f32.mrb[19].mxu1  ;;  %v948_v19 = vsel %vm872_vm8, %v752_v7, %v910_v11 }
 0x1ed   :  { %v757_v16 = vadd.f32 %v2892_v5, %v756_v15  ;;  %v947_v17 = vsel %vm871_vm7, %v747_v9, %v909_v12 }
 0x1ee   :  { %v912_v18 = vmul.f32 0.01, %v762_v14  ;;  %2246 = vmatprep.mubr.f32.mxu0 %v947_v17  ;;  %vm874_vm10 = vcmp.gt.f32.partialorder %v762_v14, 0.0 }
 0x1ef   :  { %v911_v20 = vmul.f32 0.01, %v757_v16  ;;  %v2165_v21 = vpop.f32.mrb[20].mxu1  ;;  %2247 = vmatmul.mubr.f32.gmra.mrb[54].mxu0 %v948_v19  ;;  %vm873_vm9 = vcmp.gt.f32.partialorder %v757_v16, 0.0 }
 0x1f0   :  { %v772_v22 = vadd.f32 %v2165_v21, %v2892_v5  ;;  %v766_v23 = vpop.f32.mrb[21].mxu1  ;;  %v950_v28 = vsel %vm874_vm10, %v762_v14, %v912_v18 }
 0x1f1   :  { %v767_v24 = vadd.f32 %v2892_v5, %v766_v23  ;;  %v949_v26 = vsel %vm873_vm9, %v757_v16, %v911_v20 }
 0x1f2   :  { %v914_v27 = vmul.f32 0.01, %v772_v22  ;;  %2249 = vmatprep.mubr.f32.mxu0 %v949_v26  ;;  %vm876_vm12 = vcmp.gt.f32.partialorder %v772_v22, 0.0 }
 0x1f3   :  { %v913_v29 = vmul.f32 0.01, %v767_v24  ;;  %v2168_v30 = vpop.f32.mrb[22].mxu1  ;;  %2250 = vmatmul.mubr.f32.gmra.mrb[56].mxu0 %v950_v28  ;;  %vm875_vm11 = vcmp.gt.f32.partialorder %v767_v24, 0.0 }
 0x1f4   :  { %v782_v31 = vadd.f32 %v2168_v30, %v2892_v5  ;;  %v776_v32 = vpop.f32.mrb[23].mxu1  ;;  %v952_v36 = vsel %vm876_vm12, %v772_v22, %v914_v27 }
 0x1f5   :  { %v777_v33 = vadd.f32 %v2892_v5, %v776_v32  ;;  %v951_v34 = vsel %vm875_vm11, %v767_v24, %v913_v29 }
 0x1f6   :  { %v916_v35 = vmul.f32 0.01, %v782_v31  ;;  %2252 = vmatprep.mubr.f32.mxu0 %v951_v34  ;;  %vm878_vm14 = vcmp.gt.f32.partialorder %v782_v31, 0.0  ;;  %v1374_v34 = vld [vmem:[#allocation2 + $0x68] sm:$0xff] }
 0x1f7   :  { %v915_v37 = vmul.f32 0.01, %v777_v33  ;;  %v2171_v38 = vpop.f32.mrb[24].mxu1  ;;  %2253 = vmatmul.mubr.f32.gmra.mrb[58].mxu0 %v952_v36  ;;  %vm877_vm13 = vcmp.gt.f32.partialorder %v777_v33, 0.0  ;;  %v1376_v36 = vld [vmem:[#allocation2 + $0x78] sm:$0xff] }
 0x1f8   :  { %v792_v39 = vadd.f32 %v2171_v38, %v2892_v5  ;;  %v786_v40 = vpop.f32.mrb[25].mxu1  ;;  %v954_v44 = vsel %vm878_vm14, %v782_v31, %v916_v35  ;;  %v2943_v38 = vld [vmem:[%s3146_s6] ss:$0 sm:$0xff] }
 0x1f9   :  { %v787_v41 = vadd.f32 %v2892_v5, %v786_v40  ;;  %v953_v42 = vsel %vm877_vm13, %v777_v33, %v915_v37  ;;  %v1373_v33 = vld [vmem:[#allocation2 + $0x60] sm:$0xff] }
 0x1fa   :  { %v918_v43 = vmul.f32 0.01, %v792_v39  ;;  %2255 = vmatprep.mubr.f32.mxu0 %v953_v42  ;;  %vm880_vm0 = vcmp.gt.f32.partialorder %v792_v39, 0.0  ;;  %v2460_v35 = vpack.c.bf16 %v1374_v34, %v1373_v33 }
 0x1fb   :  { %v917_v45 = vmul.f32 0.01, %v787_v41  ;;  %v2174_v46 = vpop.f32.mrb[26].mxu1  ;;  %2256 = vmatmul.mubr.f32.gmra.mrb[60].mxu0 %v954_v44  ;;  %vm879_vm15 = vcmp.gt.f32.partialorder %v787_v41, 0.0 }
 0x1fc   :  { %v802_v47 = vadd.f32 %v2174_v46, %v2892_v5  ;;  %v796_v48 = vpop.f32.mrb[27].mxu1  ;;  %v956_v52 = vsel %vm880_vm0, %v792_v39, %v918_v43  ;;  %2461 = vmatprep.subr.bf16.mxu0 %v2460_v35  ;;  %2474 = vmatprep.subr.bf16.mxu1 %v2460_v35 }
 0x1fd   :  { %v797_v49 = vadd.f32 %v2892_v5, %v796_v48  ;;  %v955_v50 = vsel %vm879_vm15, %v787_v41, %v917_v45  ;;  %2463 = vmatpush3.bf16.msra.mxu0 %v2460_v35  ;;  %2482 = vmatpush3.bf16.msra.mxu1 %v2460_v35 }
 0x1fe   :  { %v920_v51 = vmul.f32 0.01, %v802_v47  ;;  %2258 = vmatprep.mubr.f32.mxu0 %v955_v50  ;;  %vm882_vm2 = vcmp.gt.f32.partialorder %v802_v47, 0.0 }
 0x1ff   :  { %v919_v53 = vmul.f32 0.01, %v797_v49  ;;  %v2177_v54 = vpop.f32.mrb[28].mxu1  ;;  %2259 = vmatmul.mubr.f32.gmra.mrb[62].mxu0 %v956_v52  ;;  %vm881_vm1 = vcmp.gt.f32.partialorder %v797_v49, 0.0 }
 0x200   :  { %v812_v55 = vadd.f32 %v2177_v54, %v2892_v5  ;;  %v806_v56 = vpop.f32.mrb[29].mxu1  ;;  %v958_v59 = vsel %vm882_vm2, %v802_v47, %v920_v51 }
 0x201   :  { %v807_v57 = vadd.f32 %v2892_v5, %v806_v56  ;;  %v957_v25 = vsel %vm881_vm1, %v797_v49, %v919_v53 }
 0x202   :  { %v922_v58 = vmul.f32 0.01, %v812_v55  ;;  %2261 = vmatprep.mubr.f32.mxu0 %v957_v25  ;;  %vm884_vm4 = vcmp.gt.f32.partialorder %v812_v55, 0.0 }
 0x203   :  { %v921_v60 = vmul.f32 0.01, %v807_v57  ;;  %v2180_v61 = vpop.f32.mrb[30].mxu1  ;;  %2262 = vmatmul.mubr.f32.gmra.mrb[64].mxu0 %v958_v59  ;;  %vm883_vm3 = vcmp.gt.f32.partialorder %v807_v57, 0.0 }
 0x204   :  { %v822_v62 = vadd.f32 %v2180_v61, %v2892_v5  ;;  %v816_v63 = vpop.f32.mrb[31].mxu1  ;;  %v960_v3 = vsel %vm884_vm4, %v812_v55, %v922_v58 }
 0x205   :  { %v817_v0 = vadd.f32 %v2892_v5, %v816_v63  ;;  %v959_v1 = vsel %vm883_vm3, %v807_v57, %v921_v60 }
 0x206   :  { %v924_v2 = vmul.f32 0.01, %v822_v62  ;;  %2264 = vmatprep.mubr.f32.mxu0 %v959_v1  ;;  %vm886_vm6 = vcmp.gt.f32.partialorder %v822_v62, 0.0 }
 0x207   :  { %v923_v6 = vmul.f32 0.01, %v817_v0  ;;  %v2183_v7 = vpop.f32.mrb[32].mxu1  ;;  %2265 = vmatmul.mubr.f32.gmra.mrb[66].mxu0 %v960_v3  ;;  %vm885_vm5 = vcmp.gt.f32.partialorder %v817_v0, 0.0 }
 0x208   :  { %v832_v8 = vadd.f32 %v2183_v7, %v2892_v5  ;;  %v826_v9 = vpop.f32.mrb[33].mxu1  ;;  %v962_v12 = vsel %vm886_vm6, %v822_v62, %v924_v2 }
 0x209   :  { %v827_v10 = vadd.f32 %v2892_v5, %v826_v9  ;;  %v961_v11 = vsel %vm885_vm5, %v817_v0, %v923_v6 }
 0x20a   :  { %v926_v4 = vmul.f32 0.01, %v832_v8  ;;  %2267 = vmatprep.mubr.f32.mxu0 %v961_v11  ;;  %vm888_vm8 = vcmp.gt.f32.partialorder %v832_v8, 0.0 }
 0x20b   :  { %v925_v13 = vmul.f32 0.01, %v827_v10  ;;  %v2186_v14 = vpop.f32.mrb[34].mxu1  ;;  %2268 = vmatmul.mubr.f32.gmra.mrb[68].mxu0 %v962_v12  ;;  %vm887_vm7 = vcmp.gt.f32.partialorder %v827_v10, 0.0 }
 0x20c   :  { %v842_v15 = vadd.f32 %v2186_v14, %v2892_v5  ;;  %v836_v16 = vpop.f32.mrb[35].mxu1  ;;  %v964_v20 = vsel %vm888_vm8, %v832_v8, %v926_v4 }
 0x20d   :  { %v837_v17 = vadd.f32 %v2892_v5, %v836_v16  ;;  %v963_v18 = vsel %vm887_vm7, %v827_v10, %v925_v13 }
 0x20e   :  { %v928_v19 = vmul.f32 0.01, %v842_v15  ;;  %2270 = vmatprep.mubr.f32.mxu0 %v963_v18  ;;  %vm890_vm10 = vcmp.gt.f32.partialorder %v842_v15, 0.0 }
 0x20f   :  { %v927_v21 = vmul.f32 0.01, %v837_v17  ;;  %v2189_v22 = vpop.f32.mrb[36].mxu1  ;;  %2271 = vmatmul.mubr.f32.gmra.mrb[70].mxu0 %v964_v20  ;;  %vm889_vm9 = vcmp.gt.f32.partialorder %v837_v17, 0.0 }
 0x210   :  { %v852_v23 = vadd.f32 %v2189_v22, %v2892_v5  ;;  %v846_v24 = vpop.f32.mrb[37].mxu1  ;;  %v966_v29 = vsel %vm890_vm10, %v842_v15, %v928_v19 }
 0x211   :  { %v847_v26 = vadd.f32 %v2892_v5, %v846_v24  ;;  %v965_v27 = vsel %vm889_vm9, %v837_v17, %v927_v21  ;;  %v1375_v5 = vld [vmem:[#allocation2 + $0x70] sm:$0xff] }
 0x212   :  { %v930_v28 = vmul.f32 0.01, %v852_v23  ;;  %2273 = vmatprep.mubr.f32.mxu0 %v965_v27  ;;  %vm892_vm12 = vcmp.gt.f32.partialorder %v852_v23, 0.0  ;;  %v2464_v37 = vpack.c.bf16 %v1376_v36, %v1375_v5 }
 0x213   :  { %v929_v30 = vmul.f32 0.01, %v847_v26  ;;  %2274 = vmatmul.mubr.f32.gmra.mrb[72].mxu0 %v966_v29  ;;  %vm891_vm11 = vcmp.gt.f32.partialorder %v847_v26, 0.0 }
 0x214   :  { %v968_v32 = vsel %vm892_vm12, %v852_v23, %v930_v28  ;;  %2465 = vmatprep.subr.bf16.mxu0 %v2464_v37  ;;  %2475 = vmatprep.subr.bf16.mxu1 %v2464_v37 }
 0x215   :  { %v967_v31 = vsel %vm891_vm11, %v847_v26, %v929_v30  ;;  %2467 = vmatpush3.bf16.msra.mxu0 %v2464_v37  ;;  %2483 = vmatpush3.bf16.msra.mxu1 %v2464_v37 }
 0x216   :  { %2276 = vmatprep.mubr.f32.mxu0 %v967_v31 }
 0x217   :  { %2277 = vmatmul.mubr.f32.gmra.mrb[74].mxu0 %v968_v32 }
 0x2a2   :  { %v2224_v39 = vpop.f32.mrb[38].mxu0 }
 0x2a3   :  { %v1064_v40 = vadd.f32 %v2224_v39, %v2943_v38  ;;  %v1058_v41 = vpop.f32.mrb[39].mxu0 }
 0x2a4   :  { %v1059_v42 = vadd.f32 %v2943_v38, %v1058_v41 }
 0x2a5   :  { %v1286_v43 = vmul.f32 0.01, %v1064_v40  ;;  %vm1248_vm13 = vcmp.gt.f32.partialorder %v1064_v40, 0.0 }
 0x2a6   :  { %v1285_v44 = vmul.f32 0.01, %v1059_v42  ;;  %v2227_v45 = vpop.f32.mrb[40].mxu0  ;;  %vm1247_vm14 = vcmp.gt.f32.partialorder %v1059_v42, 0.0 }
 0x2a7   :  { %v1074_v46 = vadd.f32 %v2227_v45, %v2943_v38  ;;  %v1068_v47 = vpop.f32.mrb[41].mxu0  ;;  %v1324_v50 = vsel %vm1248_vm13, %v1064_v40, %v1286_v43 }
 0x2a8   :  { %v1069_v48 = vadd.f32 %v2943_v38, %v1068_v47  ;;  %v1323_v49 = vsel %vm1247_vm14, %v1059_v42, %v1285_v44 }
 0x2a9   :  { %v1288_v51 = vmul.f32 0.01, %v1074_v46  ;;  %2311 = vmatprep.mubr.f32.mxu0 %v1323_v49  ;;  %vm1250_vm0 = vcmp.gt.f32.partialorder %v1074_v46, 0.0 }
 0x2aa   :  { %v1287_v52 = vmul.f32 0.01, %v1069_v48  ;;  %v2230_v53 = vpop.f32.mrb[42].mxu0  ;;  %2312 = vmatmul.mubr.f32.vlgmr.msra.gmra.mrb[76].mxu0 %v1324_v50  ;;  %vm1249_vm15 = vcmp.gt.f32.partialorder %v1069_v48, 0.0 }
 0x2ab   :  { %v1084_v54 = vadd.f32 %v2230_v53, %v2943_v38  ;;  %v1078_v55 = vpop.f32.mrb[43].mxu0  ;;  %v1326_v58 = vsel %vm1250_vm0, %v1074_v46, %v1288_v51 }
 0x2ac   :  { %v1079_v56 = vadd.f32 %v2943_v38, %v1078_v55  ;;  %v1325_v57 = vsel %vm1249_vm15, %v1069_v48, %v1287_v52 }
 0x2ad   :  { %v1290_v25 = vmul.f32 0.01, %v1084_v54  ;;  %2314 = vmatprep.mubr.f32.mxu0 %v1325_v57  ;;  %vm1252_vm2 = vcmp.gt.f32.partialorder %v1084_v54, 0.0 }
 0x2ae   :  { %v1289_v59 = vmul.f32 0.01, %v1079_v56  ;;  %v2233_v60 = vpop.f32.mrb[44].mxu0  ;;  %2315 = vmatmul.mubr.f32.gmra.mrb[78].mxu0 %v1326_v58  ;;  %vm1251_vm1 = vcmp.gt.f32.partialorder %v1079_v56, 0.0 }
 0x2af   :  { %v1094_v61 = vadd.f32 %v2233_v60, %v2943_v38  ;;  %v1088_v62 = vpop.f32.mrb[45].mxu0  ;;  %v1328_v2 = vsel %vm1252_vm2, %v1084_v54, %v1290_v25 }
 0x2b0   :  { %v1089_v63 = vadd.f32 %v2943_v38, %v1088_v62  ;;  %v1327_v0 = vsel %vm1251_vm1, %v1079_v56, %v1289_v59 }
 0x2b1   :  { %v1292_v1 = vmul.f32 0.01, %v1094_v61  ;;  %2317 = vmatprep.mubr.f32.mxu0 %v1327_v0  ;;  %vm1254_vm3 = vcmp.gt.f32.partialorder %v1094_v61, 0.0 }
 0x2b2   :  { %v1291_v3 = vmul.f32 0.01, %v1089_v63  ;;  %v2236_v6 = vpop.f32.mrb[46].mxu0  ;;  %2318 = vmatmul.mubr.f32.gmra.mrb[80].mxu0 %v1328_v2  ;;  %vm1253_vm4 = vcmp.gt.f32.partialorder %v1089_v63, 0.0 }
 0x2b3   :  { %v1104_v7 = vadd.f32 %v2236_v6, %v2943_v38  ;;  %v1098_v8 = vpop.f32.mrb[47].mxu0  ;;  %v1330_v11 = vsel %vm1254_vm3, %v1094_v61, %v1292_v1 }
 0x2b4   :  { %v1099_v9 = vadd.f32 %v2943_v38, %v1098_v8  ;;  %v1329_v10 = vsel %vm1253_vm4, %v1089_v63, %v1291_v3 }
 0x2b5   :  { %v1294_v4 = vmul.f32 0.01, %v1104_v7  ;;  %2320 = vmatprep.mubr.f32.mxu1 %v1329_v10  ;;  %vm1256_vm6 = vcmp.gt.f32.partialorder %v1104_v7, 0.0 }
 0x2b6   :  { %v1293_v12 = vmul.f32 0.01, %v1099_v9  ;;  %v2239_v13 = vpop.f32.mrb[48].mxu0  ;;  %2321 = vmatmul.mubr.f32.vlgmr.msra.gmra.mrb[38].mxu1 %v1330_v11  ;;  %vm1255_vm5 = vcmp.gt.f32.partialorder %v1099_v9, 0.0 }
 0x2b7   :  { %v1114_v14 = vadd.f32 %v2239_v13, %v2943_v38  ;;  %v1108_v15 = vpop.f32.mrb[49].mxu0  ;;  %v1332_v19 = vsel %vm1256_vm6, %v1104_v7, %v1294_v4 }
 0x2b8   :  { %v1109_v16 = vadd.f32 %v2943_v38, %v1108_v15  ;;  %v1331_v17 = vsel %vm1255_vm5, %v1099_v9, %v1293_v12 }
 0x2b9   :  { %v1296_v18 = vmul.f32 0.01, %v1114_v14  ;;  %2323 = vmatprep.mubr.f32.mxu1 %v1331_v17  ;;  %vm1258_vm8 = vcmp.gt.f32.partialorder %v1114_v14, 0.0 }
 0x2ba   :  { %v1295_v20 = vmul.f32 0.01, %v1109_v16  ;;  %v2242_v21 = vpop.f32.mrb[50].mxu0  ;;  %2324 = vmatmul.mubr.f32.gmra.mrb[40].mxu1 %v1332_v19  ;;  %vm1257_vm7 = vcmp.gt.f32.partialorder %v1109_v16, 0.0 }
 0x2bb   :  { %v1124_v22 = vadd.f32 %v2242_v21, %v2943_v38  ;;  %v1118_v23 = vpop.f32.mrb[51].mxu0  ;;  %v1334_v28 = vsel %vm1258_vm8, %v1114_v14, %v1296_v18 }
 0x2bc   :  { %v1119_v24 = vadd.f32 %v2943_v38, %v1118_v23  ;;  %v1333_v26 = vsel %vm1257_vm7, %v1109_v16, %v1295_v20 }
 0x2bd   :  { %v1298_v27 = vmul.f32 0.01, %v1124_v22  ;;  %2326 = vmatprep.mubr.f32.mxu1 %v1333_v26  ;;  %vm1260_vm10 = vcmp.gt.f32.partialorder %v1124_v22, 0.0 }
 0x2be   :  { %v1297_v29 = vmul.f32 0.01, %v1119_v24  ;;  %v2245_v30 = vpop.f32.mrb[52].mxu0  ;;  %2327 = vmatmul.mubr.f32.gmra.mrb[42].mxu1 %v1334_v28  ;;  %vm1259_vm9 = vcmp.gt.f32.partialorder %v1119_v24, 0.0 }
 0x2bf   :  { %v1134_v31 = vadd.f32 %v2245_v30, %v2943_v38  ;;  %v1128_v32 = vpop.f32.mrb[53].mxu0  ;;  %v1336_v5 = vsel %vm1260_vm10, %v1124_v22, %v1298_v27 }
 0x2c0   :  { %v1129_v33 = vadd.f32 %v2943_v38, %v1128_v32  ;;  %v1335_v34 = vsel %vm1259_vm9, %v1119_v24, %v1297_v29 }
 0x2c1   :  { %v1300_v35 = vmul.f32 0.01, %v1134_v31  ;;  %2329 = vmatprep.mubr.f32.mxu1 %v1335_v34  ;;  %vm1262_vm12 = vcmp.gt.f32.partialorder %v1134_v31, 0.0 }
 0x2c2   :  { %v1299_v36 = vmul.f32 0.01, %v1129_v33  ;;  %v2248_v37 = vpop.f32.mrb[54].mxu0  ;;  %2330 = vmatmul.mubr.f32.gmra.mrb[44].mxu1 %v1336_v5  ;;  %vm1261_vm11 = vcmp.gt.f32.partialorder %v1129_v33, 0.0 }
 0x2c3   :  { %v1144_v39 = vadd.f32 %v2248_v37, %v2943_v38  ;;  %v1138_v40 = vpop.f32.mrb[55].mxu0  ;;  %v1338_v44 = vsel %vm1262_vm12, %v1134_v31, %v1300_v35 }
 0x2c4   :  { %v1139_v41 = vadd.f32 %v2943_v38, %v1138_v40  ;;  %v1337_v42 = vsel %vm1261_vm11, %v1129_v33, %v1299_v36 }
 0x2c5   :  { %v1302_v43 = vmul.f32 0.01, %v1144_v39  ;;  %2332 = vmatprep.mubr.f32.mxu1 %v1337_v42  ;;  %vm1264_vm14 = vcmp.gt.f32.partialorder %v1144_v39, 0.0 }
 0x2c6   :  { %v1301_v45 = vmul.f32 0.01, %v1139_v41  ;;  %v2251_v46 = vpop.f32.mrb[56].mxu0  ;;  %2333 = vmatmul.mubr.f32.gmra.mrb[46].mxu1 %v1338_v44  ;;  %vm1263_vm13 = vcmp.gt.f32.partialorder %v1139_v41, 0.0 }
 0x2c7   :  { %v1154_v47 = vadd.f32 %v2251_v46, %v2943_v38  ;;  %v1148_v48 = vpop.f32.mrb[57].mxu0  ;;  %v1340_v52 = vsel %vm1264_vm14, %v1144_v39, %v1302_v43 }
 0x2c8   :  { %v1149_v49 = vadd.f32 %v2943_v38, %v1148_v48  ;;  %v1339_v50 = vsel %vm1263_vm13, %v1139_v41, %v1301_v45 }
 0x2c9   :  { %v1304_v51 = vmul.f32 0.01, %v1154_v47  ;;  %2335 = vmatprep.mubr.f32.mxu1 %v1339_v50  ;;  %vm1266_vm0 = vcmp.gt.f32.partialorder %v1154_v47, 0.0 }
 0x2ca   :  { %v1303_v53 = vmul.f32 0.01, %v1149_v49  ;;  %v2254_v54 = vpop.f32.mrb[58].mxu0  ;;  %2336 = vmatmul.mubr.f32.gmra.mrb[48].mxu1 %v1340_v52  ;;  %vm1265_vm15 = vcmp.gt.f32.partialorder %v1149_v49, 0.0 }
 0x2cb   :  { %v1164_v55 = vadd.f32 %v2254_v54, %v2943_v38  ;;  %v1158_v56 = vpop.f32.mrb[59].mxu0  ;;  %v1342_v59 = vsel %vm1266_vm0, %v1154_v47, %v1304_v51 }
 0x2cc   :  { %v1159_v57 = vadd.f32 %v2943_v38, %v1158_v56  ;;  %v1341_v25 = vsel %vm1265_vm15, %v1149_v49, %v1303_v53 }
 0x2cd   :  { %v1306_v58 = vmul.f32 0.01, %v1164_v55  ;;  %2338 = vmatprep.mubr.f32.mxu1 %v1341_v25  ;;  %vm1268_vm2 = vcmp.gt.f32.partialorder %v1164_v55, 0.0 }
 0x2ce   :  { %v1305_v60 = vmul.f32 0.01, %v1159_v57  ;;  %v2257_v61 = vpop.f32.mrb[60].mxu0  ;;  %2339 = vmatmul.mubr.f32.gmra.mrb[50].mxu1 %v1342_v59  ;;  %vm1267_vm1 = vcmp.gt.f32.partialorder %v1159_v57, 0.0 }
 0x2cf   :  { %v1174_v62 = vadd.f32 %v2257_v61, %v2943_v38  ;;  %v1168_v63 = vpop.f32.mrb[61].mxu0  ;;  %v1344_v3 = vsel %vm1268_vm2, %v1164_v55, %v1306_v58 }
 0x2d0   :  { %v1169_v0 = vadd.f32 %v2943_v38, %v1168_v63  ;;  %v1343_v1 = vsel %vm1267_vm1, %v1159_v57, %v1305_v60 }
 0x2d1   :  { %v1308_v2 = vmul.f32 0.01, %v1174_v62  ;;  %2341 = vmatprep.mubr.f32.mxu1 %v1343_v1  ;;  %vm1270_vm4 = vcmp.gt.f32.partialorder %v1174_v62, 0.0 }
 0x2d2   :  { %v1307_v6 = vmul.f32 0.01, %v1169_v0  ;;  %v2260_v7 = vpop.f32.mrb[62].mxu0  ;;  %2342 = vmatmul.mubr.f32.gmra.mrb[52].mxu1 %v1344_v3  ;;  %vm1269_vm3 = vcmp.gt.f32.partialorder %v1169_v0, 0.0 }
 0x2d3   :  { %v1184_v8 = vadd.f32 %v2260_v7, %v2943_v38  ;;  %v1178_v9 = vpop.f32.mrb[63].mxu0  ;;  %v1346_v12 = vsel %vm1270_vm4, %v1174_v62, %v1308_v2 }
 0x2d4   :  { %v1179_v10 = vadd.f32 %v2943_v38, %v1178_v9  ;;  %v1345_v11 = vsel %vm1269_vm3, %v1169_v0, %v1307_v6  ;;  %v2986_v0 = vld [vmem:[%s3148_s8] ss:$0 sm:$0xff] }
 0x2d5   :  { %v1310_v4 = vmul.f32 0.01, %v1184_v8  ;;  %2344 = vmatprep.mubr.f32.mxu1 %v1345_v11  ;;  %vm1272_vm6 = vcmp.gt.f32.partialorder %v1184_v8, 0.0 }
 0x2d6   :  { %v1309_v13 = vmul.f32 0.01, %v1179_v10  ;;  %v2263_v14 = vpop.f32.mrb[64].mxu0  ;;  %2345 = vmatmul.mubr.f32.gmra.mrb[54].mxu1 %v1346_v12  ;;  %vm1271_vm5 = vcmp.gt.f32.partialorder %v1179_v10, 0.0 }
 0x2d7   :  { %v1194_v15 = vadd.f32 %v2263_v14, %v2943_v38  ;;  %v1188_v16 = vpop.f32.mrb[65].mxu0  ;;  %v1348_v20 = vsel %vm1272_vm6, %v1184_v8, %v1310_v4 }
 0x2d8   :  { %v1189_v17 = vadd.f32 %v2943_v38, %v1188_v16  ;;  %v1347_v18 = vsel %vm1271_vm5, %v1179_v10, %v1309_v13 }
 0x2d9   :  { %v1312_v19 = vmul.f32 0.01, %v1194_v15  ;;  %2347 = vmatprep.mubr.f32.mxu1 %v1347_v18  ;;  %vm1274_vm8 = vcmp.gt.f32.partialorder %v1194_v15, 0.0 }
 0x2da   :  { %v1311_v21 = vmul.f32 0.01, %v1189_v17  ;;  %v2266_v22 = vpop.f32.mrb[66].mxu0  ;;  %2348 = vmatmul.mubr.f32.gmra.mrb[56].mxu1 %v1348_v20  ;;  %vm1273_vm7 = vcmp.gt.f32.partialorder %v1189_v17, 0.0 }
 0x2db   :  { %v1204_v23 = vadd.f32 %v2266_v22, %v2943_v38  ;;  %v1198_v24 = vpop.f32.mrb[67].mxu0  ;;  %v1350_v29 = vsel %vm1274_vm8, %v1194_v15, %v1312_v19 }
 0x2dc   :  { %v1199_v26 = vadd.f32 %v2943_v38, %v1198_v24  ;;  %v1349_v27 = vsel %vm1273_vm7, %v1189_v17, %v1311_v21 }
 0x2dd   :  { %v1314_v28 = vmul.f32 0.01, %v1204_v23  ;;  %2350 = vmatprep.mubr.f32.mxu1 %v1349_v27  ;;  %vm1276_vm10 = vcmp.gt.f32.partialorder %v1204_v23, 0.0 }
 0x2de   :  { %v1313_v30 = vmul.f32 0.01, %v1199_v26  ;;  %v2269_v31 = vpop.f32.mrb[68].mxu0  ;;  %2351 = vmatmul.mubr.f32.gmra.mrb[58].mxu1 %v1350_v29  ;;  %vm1275_vm9 = vcmp.gt.f32.partialorder %v1199_v26, 0.0 }
 0x2df   :  { %v1214_v32 = vadd.f32 %v2269_v31, %v2943_v38  ;;  %v1208_v33 = vpop.f32.mrb[69].mxu0  ;;  %v1352_v36 = vsel %vm1276_vm10, %v1204_v23, %v1314_v28 }
 0x2e0   :  { %v1209_v34 = vadd.f32 %v2943_v38, %v1208_v33  ;;  %v1351_v35 = vsel %vm1275_vm9, %v1199_v26, %v1313_v30 }
 0x2e1   :  { %v1316_v5 = vmul.f32 0.01, %v1214_v32  ;;  %2353 = vmatprep.mubr.f32.mxu1 %v1351_v35  ;;  %vm1278_vm12 = vcmp.gt.f32.partialorder %v1214_v32, 0.0 }
 0x2e2   :  { %v1315_v37 = vmul.f32 0.01, %v1209_v34  ;;  %v2272_v39 = vpop.f32.mrb[70].mxu0  ;;  %2354 = vmatmul.mubr.f32.gmra.mrb[60].mxu1 %v1352_v36  ;;  %vm1277_vm11 = vcmp.gt.f32.partialorder %v1209_v34, 0.0 }
 0x2e3   :  { %v1224_v40 = vadd.f32 %v2272_v39, %v2943_v38  ;;  %v1218_v41 = vpop.f32.mrb[71].mxu0  ;;  %v1354_v45 = vsel %vm1278_vm12, %v1214_v32, %v1316_v5 }
 0x2e4   :  { %v1219_v42 = vadd.f32 %v2943_v38, %v1218_v41  ;;  %v1353_v43 = vsel %vm1277_vm11, %v1209_v34, %v1315_v37 }
 0x2e5   :  { %v1318_v44 = vmul.f32 0.01, %v1224_v40  ;;  %2356 = vmatprep.mubr.f32.mxu1 %v1353_v43  ;;  %vm1280_vm14 = vcmp.gt.f32.partialorder %v1224_v40, 0.0 }
 0x2e6   :  { %v1317_v46 = vmul.f32 0.01, %v1219_v42  ;;  %v2275_v47 = vpop.f32.mrb[72].mxu0  ;;  %2357 = vmatmul.mubr.f32.gmra.mrb[62].mxu1 %v1354_v45  ;;  %vm1279_vm13 = vcmp.gt.f32.partialorder %v1219_v42, 0.0 }
 0x2e7   :  { %v1234_v48 = vadd.f32 %v2275_v47, %v2943_v38  ;;  %v1228_v49 = vpop.f32.mrb[73].mxu0  ;;  %v1356_v53 = vsel %vm1280_vm14, %v1224_v40, %v1318_v44 }
 0x2e8   :  { %v1229_v50 = vadd.f32 %v2943_v38, %v1228_v49  ;;  %v1355_v51 = vsel %vm1279_vm13, %v1219_v42, %v1317_v46 }
 0x2e9   :  { %v1320_v52 = vmul.f32 0.01, %v1234_v48  ;;  %2359 = vmatprep.mubr.f32.mxu1 %v1355_v51  ;;  %vm1282_vm0 = vcmp.gt.f32.partialorder %v1234_v48, 0.0 }
 0x2ea   :  { %v1319_v54 = vmul.f32 0.01, %v1229_v50  ;;  %v2278_v55 = vpop.f32.mrb[74].mxu0  ;;  %2360 = vmatmul.mubr.f32.gmra.mrb[64].mxu1 %v1356_v53  ;;  %vm1281_vm15 = vcmp.gt.f32.partialorder %v1229_v50, 0.0 }
 0x2eb   :  { %v1244_v56 = vadd.f32 %v2278_v55, %v2943_v38  ;;  %v1238_v57 = vpop.f32.mrb[75].mxu0  ;;  %v1358_v60 = vsel %vm1282_vm0, %v1234_v48, %v1320_v52 }
 0x2ec   :  { %v1239_v25 = vadd.f32 %v2943_v38, %v1238_v57  ;;  %v1357_v58 = vsel %vm1281_vm15, %v1229_v50, %v1319_v54 }
 0x2ed   :  { %v1322_v59 = vmul.f32 0.01, %v1244_v56  ;;  %2362 = vmatprep.mubr.f32.mxu1 %v1357_v58  ;;  %vm1284_vm2 = vcmp.gt.f32.partialorder %v1244_v56, 0.0 }
 0x2ee   :  { %v1321_v61 = vmul.f32 0.01, %v1239_v25  ;;  %2363 = vmatmul.mubr.f32.gmra.mrb[66].mxu1 %v1358_v60  ;;  %vm1283_vm1 = vcmp.gt.f32.partialorder %v1239_v25, 0.0 }
 0x2ef   :  { %v1360_v63 = vsel %vm1284_vm2, %v1244_v56, %v1322_v59 }
 0x2f0   :  { %v1359_v62 = vsel %vm1283_vm1, %v1239_v25, %v1321_v61 }
 0x2f1   :  { %2365 = vmatprep.mubr.f32.mxu1 %v1359_v62 }
 0x2f2   :  { %2366 = vmatmul.mubr.f32.gmra.mrb[68].mxu1 %v1360_v63 }
 0x37d   :  { %v2313_v1 = vpop.f32.mrb[76].mxu0 }
 0x37e   :  { %v1456_v38 = vadd.f32 %v2313_v1, %v2986_v0  ;;  %v1450_v2 = vpop.f32.mrb[77].mxu0 }
 0x37f   :  { %v1451_v3 = vadd.f32 %v2986_v0, %v1450_v2 }
 0x380   :  { %vm1640_vm3 = vcmp.gt.f32.partialorder %v1456_v38, 0.0  ;;  %v1678_v6 = vmul.f32 0.01, %v1456_v38 }
 0x381   :  { %vm1639_vm4 = vcmp.gt.f32.partialorder %v1451_v3, 0.0  ;;  %v1677_v7 = vmul.f32 0.01, %v1451_v3  ;;  %v2316_v8 = vpop.f32.mrb[78].mxu0 }
 0x382   :  { %v1716_v9 = vsel %vm1640_vm3, %v1456_v38, %v1678_v6  ;;  %v1466_v10 = vadd.f32 %v2316_v8, %v2986_v0  ;;  %v1460_v11 = vpop.f32.mrb[79].mxu0 }
 0x383   :  { %1754 = vst [vmem:[%s3149_s9 + $0x8] sm:$0xff] %v1716_v9  ;;  %v1715_v4 = vsel %vm1639_vm4, %v1451_v3, %v1677_v7  ;;  %v1461_v12 = vadd.f32 %v2986_v0, %v1460_v11 }
 0x384   :  { %1753 = vst [vmem:[%s3149_s9] sm:$0xff] %v1715_v4  ;;  %vm1642_vm5 = vcmp.gt.f32.partialorder %v1466_v10, 0.0  ;;  %v1680_v13 = vmul.f32 0.01, %v1466_v10 }
 0x385   :  { %vm1641_vm6 = vcmp.gt.f32.partialorder %v1461_v12, 0.0  ;;  %v1679_v14 = vmul.f32 0.01, %v1461_v12  ;;  %v2319_v15 = vpop.f32.mrb[80].mxu0 }
 0x386   :  { %v1718_v16 = vsel %vm1642_vm5, %v1466_v10, %v1680_v13  ;;  %v1476_v17 = vadd.f32 %v2319_v15, %v2986_v0  ;;  %v1470_v18 = vpop.f32.mrb[81].mxu0 }
 0x387   :  { %1756 = vst [vmem:[%s3149_s9 + $0x18] sm:$0xff] %v1718_v16  ;;  %v1717_v19 = vsel %vm1641_vm6, %v1461_v12, %v1679_v14  ;;  %v1471_v20 = vadd.f32 %v2986_v0, %v1470_v18 }
 0x388   :  { %1755 = vst [vmem:[%s3149_s9 + $0x10] sm:$0xff] %v1717_v19  ;;  %vm1644_vm7 = vcmp.gt.f32.partialorder %v1476_v17, 0.0  ;;  %v1682_v21 = vmul.f32 0.01, %v1476_v17 }
 0x389   :  { %vm1643_vm8 = vcmp.gt.f32.partialorder %v1471_v20, 0.0  ;;  %v1681_v22 = vmul.f32 0.01, %v1471_v20  ;;  %v2322_v23 = vpop.f32.mrb[38].mxu1 }
 0x38a   :  { %v1720_v24 = vsel %vm1644_vm7, %v1476_v17, %v1682_v21  ;;  %v1486_v26 = vadd.f32 %v2322_v23, %v2986_v0  ;;  %v1480_v27 = vpop.f32.mrb[39].mxu1 }
 0x38b   :  { %1758 = vst [vmem:[%s3149_s9 + $0x28] sm:$0xff] %v1720_v24  ;;  %v1719_v28 = vsel %vm1643_vm8, %v1471_v20, %v1681_v22  ;;  %v1481_v29 = vadd.f32 %v2986_v0, %v1480_v27 }
 0x38c   :  { %1757 = vst [vmem:[%s3149_s9 + $0x20] sm:$0xff] %v1719_v28  ;;  %vm1646_vm9 = vcmp.gt.f32.partialorder %v1486_v26, 0.0  ;;  %v1684_v30 = vmul.f32 0.01, %v1486_v26 }
 0x38d   :  { %vm1645_vm10 = vcmp.gt.f32.partialorder %v1481_v29, 0.0  ;;  %v1683_v31 = vmul.f32 0.01, %v1481_v29  ;;  %v2325_v32 = vpop.f32.mrb[40].mxu1 }
 0x38e   :  { %v1722_v33 = vsel %vm1646_vm9, %v1486_v26, %v1684_v30  ;;  %v1496_v34 = vadd.f32 %v2325_v32, %v2986_v0  ;;  %v1490_v35 = vpop.f32.mrb[41].mxu1 }
 0x38f   :  { %1760 = vst [vmem:[%s3149_s9 + $0x38] sm:$0xff] %v1722_v33  ;;  %v1721_v5 = vsel %vm1645_vm10, %v1481_v29, %v1683_v31  ;;  %v1491_v36 = vadd.f32 %v2986_v0, %v1490_v35 }
 0x390   :  { %1759 = vst [vmem:[%s3149_s9 + $0x30] sm:$0xff] %v1721_v5  ;;  %vm1648_vm11 = vcmp.gt.f32.partialorder %v1496_v34, 0.0  ;;  %v1686_v37 = vmul.f32 0.01, %v1496_v34 }
 0x391   :  { %vm1647_vm12 = vcmp.gt.f32.partialorder %v1491_v36, 0.0  ;;  %v1685_v39 = vmul.f32 0.01, %v1491_v36  ;;  %v2328_v40 = vpop.f32.mrb[42].mxu1 }
 0x392   :  { %v1724_v41 = vsel %vm1648_vm11, %v1496_v34, %v1686_v37  ;;  %v1506_v42 = vadd.f32 %v2328_v40, %v2986_v0  ;;  %v1500_v43 = vpop.f32.mrb[43].mxu1 }
 0x393   :  { %1762 = vst [vmem:[%s3149_s9 + $0x48] sm:$0xff] %v1724_v41  ;;  %v1723_v44 = vsel %vm1647_vm12, %v1491_v36, %v1685_v39  ;;  %v1501_v45 = vadd.f32 %v2986_v0, %v1500_v43 }
 0x394   :  { %1761 = vst [vmem:[%s3149_s9 + $0x40] sm:$0xff] %v1723_v44  ;;  %vm1650_vm13 = vcmp.gt.f32.partialorder %v1506_v42, 0.0  ;;  %v1688_v46 = vmul.f32 0.01, %v1506_v42 }
 0x395   :  { %vm1649_vm14 = vcmp.gt.f32.partialorder %v1501_v45, 0.0  ;;  %v1687_v47 = vmul.f32 0.01, %v1501_v45  ;;  %v2331_v48 = vpop.f32.mrb[44].mxu1 }
 0x396   :  { %v1726_v49 = vsel %vm1650_vm13, %v1506_v42, %v1688_v46  ;;  %v1516_v50 = vadd.f32 %v2331_v48, %v2986_v0  ;;  %v1510_v51 = vpop.f32.mrb[45].mxu1 }
 0x397   :  { %1764 = vst [vmem:[%s3149_s9 + $0x58] sm:$0xff] %v1726_v49  ;;  %v1725_v52 = vsel %vm1649_vm14, %v1501_v45, %v1687_v47  ;;  %v1511_v53 = vadd.f32 %v2986_v0, %v1510_v51 }
 0x398   :  { %1763 = vst [vmem:[%s3149_s9 + $0x50] sm:$0xff] %v1725_v52  ;;  %vm1652_vm15 = vcmp.gt.f32.partialorder %v1516_v50, 0.0  ;;  %v1690_v54 = vmul.f32 0.01, %v1516_v50 }
 0x399   :  { %vm1651_vm0 = vcmp.gt.f32.partialorder %v1511_v53, 0.0  ;;  %v1689_v55 = vmul.f32 0.01, %v1511_v53  ;;  %v2334_v56 = vpop.f32.mrb[46].mxu1 }
 0x39a   :  { %v1728_v57 = vsel %vm1652_vm15, %v1516_v50, %v1690_v54  ;;  %v1526_v25 = vadd.f32 %v2334_v56, %v2986_v0  ;;  %v1520_v58 = vpop.f32.mrb[47].mxu1 }
 0x39b   :  { %1766 = vst [vmem:[%s3149_s9 + $0x68] sm:$0xff] %v1728_v57  ;;  %v1727_v59 = vsel %vm1651_vm0, %v1511_v53, %v1689_v55  ;;  %v1521_v60 = vadd.f32 %v2986_v0, %v1520_v58 }
 0x39c   :  { %1765 = vst [vmem:[%s3149_s9 + $0x60] sm:$0xff] %v1727_v59  ;;  %vm1654_vm1 = vcmp.gt.f32.partialorder %v1526_v25, 0.0  ;;  %v1692_v61 = vmul.f32 0.01, %v1526_v25 }
 0x39d   :  { %vm1653_vm2 = vcmp.gt.f32.partialorder %v1521_v60, 0.0  ;;  %v1691_v62 = vmul.f32 0.01, %v1521_v60  ;;  %v2337_v63 = vpop.f32.mrb[48].mxu1 }
 0x39e   :  { %v1730_v1 = vsel %vm1654_vm1, %v1526_v25, %v1692_v61  ;;  %v1536_v38 = vadd.f32 %v2337_v63, %v2986_v0  ;;  %v1530_v2 = vpop.f32.mrb[49].mxu1 }
 0x39f   :  { %1768 = vst [vmem:[%s3149_s9 + $0x78] sm:$0xff] %v1730_v1  ;;  %v1729_v3 = vsel %vm1653_vm2, %v1521_v60, %v1691_v62  ;;  %v1531_v6 = vadd.f32 %v2986_v0, %v1530_v2 }
 0x3a0   :  { %1767 = vst [vmem:[%s3149_s9 + $0x70] sm:$0xff] %v1729_v3  ;;  %vm1656_vm3 = vcmp.gt.f32.partialorder %v1536_v38, 0.0  ;;  %v1694_v7 = vmul.f32 0.01, %v1536_v38 }
 0x3a1   :  { %vm1655_vm4 = vcmp.gt.f32.partialorder %v1531_v6, 0.0  ;;  %v1693_v8 = vmul.f32 0.01, %v1531_v6  ;;  %v2340_v9 = vpop.f32.mrb[50].mxu1 }
 0x3a2   :  { %v1732_v10 = vsel %vm1656_vm3, %v1536_v38, %v1694_v7  ;;  %v1546_v11 = vadd.f32 %v2340_v9, %v2986_v0  ;;  %v1540_v4 = vpop.f32.mrb[51].mxu1 }
 0x3a3   :  { %1770 = vst [vmem:[%s3149_s9 + $0x88] sm:$0xff] %v1732_v10  ;;  %v1731_v12 = vsel %vm1655_vm4, %v1531_v6, %v1693_v8  ;;  %v1541_v13 = vadd.f32 %v2986_v0, %v1540_v4 }
 0x3a4   :  { %1769 = vst [vmem:[%s3149_s9 + $0x80] sm:$0xff] %v1731_v12  ;;  %vm1658_vm5 = vcmp.gt.f32.partialorder %v1546_v11, 0.0  ;;  %v1696_v14 = vmul.f32 0.01, %v1546_v11 }
 0x3a5   :  { %vm1657_vm6 = vcmp.gt.f32.partialorder %v1541_v13, 0.0  ;;  %v1695_v15 = vmul.f32 0.01, %v1541_v13  ;;  %v2343_v16 = vpop.f32.mrb[52].mxu1 }
 0x3a6   :  { %v1734_v17 = vsel %vm1658_vm5, %v1546_v11, %v1696_v14  ;;  %v1556_v18 = vadd.f32 %v2343_v16, %v2986_v0  ;;  %v1550_v19 = vpop.f32.mrb[53].mxu1 }
 0x3a7   :  { %1772 = vst [vmem:[%s3149_s9 + $0x98] sm:$0xff] %v1734_v17  ;;  %v1733_v20 = vsel %vm1657_vm6, %v1541_v13, %v1695_v15  ;;  %v1551_v21 = vadd.f32 %v2986_v0, %v1550_v19 }
 0x3a8   :  { %1771 = vst [vmem:[%s3149_s9 + $0x90] sm:$0xff] %v1733_v20  ;;  %vm1660_vm7 = vcmp.gt.f32.partialorder %v1556_v18, 0.0  ;;  %v1698_v22 = vmul.f32 0.01, %v1556_v18 }
 0x3a9   :  { %vm1659_vm8 = vcmp.gt.f32.partialorder %v1551_v21, 0.0  ;;  %v1697_v23 = vmul.f32 0.01, %v1551_v21  ;;  %v2346_v24 = vpop.f32.mrb[54].mxu1 }
 0x3aa   :  { %v1736_v26 = vsel %vm1660_vm7, %v1556_v18, %v1698_v22  ;;  %v1566_v27 = vadd.f32 %v2346_v24, %v2986_v0  ;;  %v1560_v28 = vpop.f32.mrb[55].mxu1 }
 0x3ab   :  { %1774 = vst [vmem:[%s3149_s9 + $0xa8] sm:$0xff] %v1736_v26  ;;  %v1735_v29 = vsel %vm1659_vm8, %v1551_v21, %v1697_v23  ;;  %v1561_v30 = vadd.f32 %v2986_v0, %v1560_v28 }
 0x3ac   :  { %1773 = vst [vmem:[%s3149_s9 + $0xa0] sm:$0xff] %v1735_v29  ;;  %vm1662_vm9 = vcmp.gt.f32.partialorder %v1566_v27, 0.0  ;;  %v1700_v31 = vmul.f32 0.01, %v1566_v27 }
 0x3ad   :  { %vm1661_vm10 = vcmp.gt.f32.partialorder %v1561_v30, 0.0  ;;  %v1699_v32 = vmul.f32 0.01, %v1561_v30  ;;  %v2349_v33 = vpop.f32.mrb[56].mxu1 }
 0x3ae   :  { %v1738_v34 = vsel %vm1662_vm9, %v1566_v27, %v1700_v31  ;;  %v1576_v35 = vadd.f32 %v2349_v33, %v2986_v0  ;;  %v1570_v5 = vpop.f32.mrb[57].mxu1 }
 0x3af   :  { %1776 = vst [vmem:[%s3149_s9 + $0xb8] sm:$0xff] %v1738_v34  ;;  %v1737_v36 = vsel %vm1661_vm10, %v1561_v30, %v1699_v32  ;;  %v1571_v37 = vadd.f32 %v2986_v0, %v1570_v5 }
 0x3b0   :  { %1775 = vst [vmem:[%s3149_s9 + $0xb0] sm:$0xff] %v1737_v36  ;;  %vm1664_vm11 = vcmp.gt.f32.partialorder %v1576_v35, 0.0  ;;  %v1702_v39 = vmul.f32 0.01, %v1576_v35 }
 0x3b1   :  { %vm1663_vm12 = vcmp.gt.f32.partialorder %v1571_v37, 0.0  ;;  %v1701_v40 = vmul.f32 0.01, %v1571_v37  ;;  %v2352_v41 = vpop.f32.mrb[58].mxu1 }
 0x3b2   :  { %v1740_v42 = vsel %vm1664_vm11, %v1576_v35, %v1702_v39  ;;  %v1586_v43 = vadd.f32 %v2352_v41, %v2986_v0  ;;  %v1580_v44 = vpop.f32.mrb[59].mxu1 }
 0x3b3   :  { %1778 = vst [vmem:[%s3149_s9 + $0xc8] sm:$0xff] %v1740_v42  ;;  %v1739_v45 = vsel %vm1663_vm12, %v1571_v37, %v1701_v40  ;;  %v1581_v46 = vadd.f32 %v2986_v0, %v1580_v44 }
 0x3b4   :  { %1777 = vst [vmem:[%s3149_s9 + $0xc0] sm:$0xff] %v1739_v45  ;;  %vm1666_vm13 = vcmp.gt.f32.partialorder %v1586_v43, 0.0  ;;  %v1704_v47 = vmul.f32 0.01, %v1586_v43 }
 0x3b5   :  { %vm1665_vm14 = vcmp.gt.f32.partialorder %v1581_v46, 0.0  ;;  %v1703_v48 = vmul.f32 0.01, %v1581_v46  ;;  %v2355_v49 = vpop.f32.mrb[60].mxu1 }
 0x3b6   :  { %v1742_v50 = vsel %vm1666_vm13, %v1586_v43, %v1704_v47  ;;  %v1596_v51 = vadd.f32 %v2355_v49, %v2986_v0  ;;  %v1590_v52 = vpop.f32.mrb[61].mxu1 }
 0x3b7   :  { %1780 = vst [vmem:[%s3149_s9 + $0xd8] sm:$0xff] %v1742_v50  ;;  %v1741_v53 = vsel %vm1665_vm14, %v1581_v46, %v1703_v48  ;;  %v1591_v54 = vadd.f32 %v2986_v0, %v1590_v52 }
 0x3b8   :  { %1779 = vst [vmem:[%s3149_s9 + $0xd0] sm:$0xff] %v1741_v53  ;;  %vm1668_vm15 = vcmp.gt.f32.partialorder %v1596_v51, 0.0  ;;  %v1706_v55 = vmul.f32 0.01, %v1596_v51 }
 0x3b9   :  { %vm1667_vm0 = vcmp.gt.f32.partialorder %v1591_v54, 0.0  ;;  %v1705_v56 = vmul.f32 0.01, %v1591_v54  ;;  %v2358_v57 = vpop.f32.mrb[62].mxu1 }
 0x3ba   :  { %v1744_v25 = vsel %vm1668_vm15, %v1596_v51, %v1706_v55  ;;  %v1606_v58 = vadd.f32 %v2358_v57, %v2986_v0  ;;  %v1600_v59 = vpop.f32.mrb[63].mxu1 }
 0x3bb   :  { %1782 = vst [vmem:[%s3149_s9 + $0xe8] sm:$0xff] %v1744_v25  ;;  %v1743_v60 = vsel %vm1667_vm0, %v1591_v54, %v1705_v56  ;;  %v1601_v61 = vadd.f32 %v2986_v0, %v1600_v59 }
 0x3bc   :  { %1781 = vst [vmem:[%s3149_s9 + $0xe0] sm:$0xff] %v1743_v60  ;;  %vm1670_vm1 = vcmp.gt.f32.partialorder %v1606_v58, 0.0  ;;  %v1708_v62 = vmul.f32 0.01, %v1606_v58 }
 0x3bd   :  { %vm1669_vm2 = vcmp.gt.f32.partialorder %v1601_v61, 0.0  ;;  %v1707_v63 = vmul.f32 0.01, %v1601_v61  ;;  %v2361_v1 = vpop.f32.mrb[64].mxu1 }
 0x3be   :  { %v1746_v38 = vsel %vm1670_vm1, %v1606_v58, %v1708_v62  ;;  %v1616_v2 = vadd.f32 %v2361_v1, %v2986_v0  ;;  %v1610_v3 = vpop.f32.mrb[65].mxu1 }
 0x3bf   :  { %1784 = vst [vmem:[%s3149_s9 + $0xf8] sm:$0xff] %v1746_v38  ;;  %v1745_v6 = vsel %vm1669_vm2, %v1601_v61, %v1707_v63  ;;  %v1611_v7 = vadd.f32 %v2986_v0, %v1610_v3 }
 0x3c0   :  { %1783 = vst [vmem:[%s3149_s9 + $0xf0] sm:$0xff] %v1745_v6  ;;  %vm1672_vm3 = vcmp.gt.f32.partialorder %v1616_v2, 0.0  ;;  %v1710_v8 = vmul.f32 0.01, %v1616_v2 }
 0x3c1   :  { %vm1671_vm4 = vcmp.gt.f32.partialorder %v1611_v7, 0.0  ;;  %v1709_v9 = vmul.f32 0.01, %v1611_v7  ;;  %v2364_v10 = vpop.f32.mrb[66].mxu1 }
 0x3c2   :  { %v1748_v11 = vsel %vm1672_vm3, %v1616_v2, %v1710_v8  ;;  %v1626_v4 = vadd.f32 %v2364_v10, %v2986_v0  ;;  %v1620_v12 = vpop.f32.mrb[67].mxu1 }
 0x3c3   :  { %1786 = vst [vmem:[%s3149_s9 + $0x108] sm:$0xff] %v1748_v11  ;;  %v1747_v13 = vsel %vm1671_vm4, %v1611_v7, %v1709_v9  ;;  %v1621_v14 = vadd.f32 %v2986_v0, %v1620_v12 }
 0x3c4   :  { %1785 = vst [vmem:[%s3149_s9 + $0x100] sm:$0xff] %v1747_v13  ;;  %vm1674_vm5 = vcmp.gt.f32.partialorder %v1626_v4, 0.0  ;;  %v1712_v15 = vmul.f32 0.01, %v1626_v4 }
 0x3c5   :  { %vm1673_vm6 = vcmp.gt.f32.partialorder %v1621_v14, 0.0  ;;  %v1711_v16 = vmul.f32 0.01, %v1621_v14  ;;  %v2367_v17 = vpop.f32.mrb[68].mxu1 }
 0x3c6   :  { %v1750_v18 = vsel %vm1674_vm5, %v1626_v4, %v1712_v15  ;;  %v1636_v19 = vadd.f32 %v2367_v17, %v2986_v0  ;;  %v1630_v20 = vpop.f32.mrb[69].mxu1 }
 0x3c7   :  { %1788 = vst [vmem:[%s3149_s9 + $0x118] sm:$0xff] %v1750_v18  ;;  %v1749_v21 = vsel %vm1673_vm6, %v1621_v14, %v1711_v16  ;;  %v1631_v22 = vadd.f32 %v2986_v0, %v1630_v20 }
 0x3c8   :  { %1787 = vst [vmem:[%s3149_s9 + $0x110] sm:$0xff] %v1749_v21  ;;  %vm1676_vm7 = vcmp.gt.f32.partialorder %v1636_v19, 0.0  ;;  %v1714_v23 = vmul.f32 0.01, %v1636_v19 }
 0x3c9   :  { %vm1675_vm8 = vcmp.gt.f32.partialorder %v1631_v22, 0.0  ;;  %v1713_v24 = vmul.f32 0.01, %v1631_v22 }
 0x3ca   :  { %v1752_v26 = vsel %vm1676_vm7, %v1636_v19, %v1714_v23 }
 0x3cb   :  { %1790 = vst [vmem:[%s3149_s9 + $0x128] sm:$0xff] %v1752_v26  ;;  %v1751_v27 = vsel %vm1675_vm8, %v1631_v22, %v1713_v24 }
 0x3cc   :  { %1789 = vst [vmem:[%s3149_s9 + $0x120] sm:$0xff] %v1751_v27 }
 0x3cd   :  { %1795 = vsyncpa [#allocation3], 1 }

</bundles_post_ra>
